<compile_context>
chip_gen: v5e
topology: v5e:2x2
jax: 0.10.0
libtpu: 0.0.40
codegen_flags: <defaults>
</compile_context>

<pallas_src>
import math

import jax
import jax.numpy as jnp
from jax.experimental import pallas as pl
from jax.experimental.pallas import tpu as pltpu

_LN_EPS = 1e-5
_BN_SCALE = 1.0 / math.sqrt(1.0 + 1e-5)  # eval-mode BatchNorm1d, default stats


def _gelu(x):
    # TODO(synk): PyTorch nn.GELU() default is the exact erf form; the tanh
    # approximation is used because lax.erf is not guaranteed to lower in
    # Mosaic. Numerics differ by <1e-3.
    c = jnp.sqrt(2.0 / jnp.pi).astype(x.dtype)
    return 0.5 * x * (1.0 + jnp.tanh(c * (x + 0.044715 * x * x * x)))


# ----------------------------------------------------------------------------
# Fused forward kernel
# ----------------------------------------------------------------------------

def _hgnnp_fused_kernel(
    x_ref, hn_ref, hnt_ref,
    nft_w, nft_b, ln_g, ln_b,
    w_t1, b_t1, w_t2, b_t2, w_t3, b_t3,
    w_att, b_att,
    w_rf, b_rf,
    w_mh1, b_mh1, w_mh2, b_mh2,
    w_fe1, b_fe1, w_fe2, b_fe2,
    w_fc, b_fc,
    out_ref,
):
    f32 = jnp.float32
    bf16 = jnp.bfloat16

    def mm(a, w_ref_):
        # MXU matmul. Wide weights are stored bf16 (operands cast to the
        # weight dtype), accumulation is always f32.
        w = w_ref_[...]
        return jnp.dot(a.astype(w.dtype), w, preferred_element_type=f32)

    def linear(a, w_ref_, b_ref_, act=False):
        y = mm(a, w_ref_) + b_ref_[...]
        return _gelu(y) if act else y

    hn = hn_ref[...]      # (V, E) bf16, precomputed 'both' normalization
    hnt = hnt_ref[...]    # (E, V) bf16, its transpose (no in-kernel transpose)

    def v2e(feat_v):      # (V, D) -> (E, D)
        return jnp.dot(hnt, feat_v.astype(bf16), preferred_element_type=f32)

    def e2v(feat_e):      # (E, D) -> (V, D)
        return jnp.dot(hn, feat_e.astype(bf16), preferred_element_type=f32)

    x = x_ref[...]

    # node_feature_transform: Linear + GELU (+ Dropout = identity), LayerNorm.
    xh = linear(x, nft_w, nft_b, act=True)
    mu = jnp.mean(xh, axis=-1, keepdims=True)
    var = jnp.mean((xh - mu) * (xh - mu), axis=-1, keepdims=True)
    xh = (xh - mu) * jax.lax.rsqrt(var + _LN_EPS) * ln_g[...] + ln_b[...]

    # TODO(synk): HGNNPConv's source was not provided with the module; this
    # follows dhg's HGNN+ conv extended to return (vertex, edge, attention)
    # per the call sites: theta-linear -> eval-BN (folded into weights) ->
    # v2e -> (+edge feats) -> [attention] -> e2v -> residual -> activation.
    # Dead outputs skipped.
    def conv(feat_v, w_t, b_t, edge_in, *, att=None, vertex_out=True,
             is_last=False):
        xt = linear(feat_v, w_t, b_t)            # theta (eval-BN pre-folded)
        e_feat = v2e(xt)                         # (E, Dh)
        if edge_in is not None:
            e_feat = e_feat + edge_in
        attn = None
        if att is not None:
            # (E, 1) attention on the VPU (elementwise + lane reduce): avoids
            # a lane-width-1 MXU matmul and any narrow intermediate store.
            w_a, b_a = att
            attn = jax.nn.sigmoid(
                jnp.sum(e_feat * w_a[...], axis=-1, keepdims=True) + b_a[...])
        v_feat = None
        if vertex_out:
            v_feat = e2v(e_feat) + feat_v        # residual
            if not is_last:
                v_feat = _gelu(v_feat)
        return v_feat, e_feat, attn

    v1, e1, _ = conv(xh, w_t1, b_t1, None)       # attn1 unused
    v2, e2, _ = conv(v1, w_t2, b_t2, e1)         # attn2 unused
    # conv3: v_features3 is discarded by the model -> skip the e2v matmul.
    _, e3, conv_attn = conv(v2, w_t3, b_t3, e2, att=(w_att, b_att),
                            vertex_out=False, is_last=True)

    # edge_feature_refine: Linear + GELU (+ Dropout = identity)
    refined = linear(e3, w_rf, b_rf, act=True)   # (E, Dh)

    # Multi-head attention: all first linears batched into one (Dh, Dh) matmul;
    # the block-diagonal second linears + head-mean collapse exactly to one
    # full-Dh lane reduce (w_mh2 is pre-scaled by 1/heads, b_mh2 = mean(b2)).
    h1 = linear(refined, w_mh1, b_mh1, act=True)                 # (E, Dh)
    attn_w = jax.nn.sigmoid(
        jnp.sum(h1 * w_mh2[...], axis=-1, keepdims=True) + b_mh2[...])

    final_attn = (attn_w + conv_attn) * 0.5                      # (E, 1)
    x_w = refined * final_attn                                   # (E, Dh)

    # feature_extraction + residual (+ eval-BN folded into w_fc, Dropout = id)
    f1 = linear(x_w, w_fe1, b_fe1, act=True)
    f2 = linear(f1, w_fe2, b_fe2, act=True)
    xo = f2 + x_w

    score = jax.nn.sigmoid(mm(xo, w_fc) + b_fc[...])             # (E, od)

    # Single packed store: columns [0:od] = score, column [od] = attention.
    out_ref[...] = jnp.concatenate([score, final_attn], axis=-1)


# ----------------------------------------------------------------------------
# Wrapper
# ----------------------------------------------------------------------------

def _vmem_limit_bytes():
    # Generation-aware scoped-VMEM budget (v5e/v6e: 128 MiB phys, v7x: 64 MiB);
    # leave headroom for double buffering.
    cap = 64 * 1024 * 1024
    try:
        info = pltpu.get_tpu_info()
        cap = int(getattr(info, "vmem_capacity_bytes", cap))
    except Exception:
        pass
    return min(int(cap) * 7 // 8, 100 * 1024 * 1024)


def hgnnp_forward(X, H, flat_params, *, output_dim):
    """Single fused pallas_call for the whole HGNNP forward pass."""
    E = H.shape[1]

    # Hypergraph 'both' normalization, precomputed ONCE outside the kernel and
    # shipped bf16 in both orientations so the aggregation matmuls are plain,
    # non-transposing bf16 MXU ops (half the incidence VMEM footprint of f32).
    d_v = jnp.maximum(jnp.sum(H, axis=1, keepdims=True), 1.0)    # (V, 1)
    d_e = jnp.maximum(jnp.sum(H, axis=0, keepdims=True), 1.0)    # (1, E)
    hn = H * jax.lax.rsqrt(d_v) * jax.lax.rsqrt(d_e)             # (V, E)
    hn_bf = hn.astype(jnp.bfloat16)
    hnt_bf = hn.T.astype(jnp.bfloat16)

    flat_inputs = (X, hn_bf, hnt_bf) + tuple(flat_params)

    # TODO(synk): for large |V|/|E| this needs a tiled, pipelined grid (tile V
    # for v2e with a VMEM accumulator, tile E for e2v and the edge tail) plus
    # a 'parallel' grid axis so v7x's second TensorCore gets work; whole-array
    # VMEM blocks with grid=(1,) are used because the tested sizes fit easily.
    out = pl.pallas_call(
        _hgnnp_fused_kernel,
        grid=(1,),
        in_specs=[pl.BlockSpec(a.shape, lambda i: (0, 0)) for a in flat_inputs],
        out_specs=pl.BlockSpec((E, output_dim + 1), lambda i: (0, 0)),
        out_shape=jax.ShapeDtypeStruct((E, output_dim + 1), jnp.float32),
        compiler_params=pltpu.CompilerParams(
            dimension_semantics=("arbitrary",),
            vmem_limit_bytes=_vmem_limit_bytes(),
        ),
    )(*flat_inputs)

    return out[:, :output_dim], out[:, output_dim:]


# ----------------------------------------------------------------------------
# Deterministic parameter construction (PyTorch nn.Linear default init)
# ----------------------------------------------------------------------------

def _init_linear(key, fan_in, fan_out):
    kw, kb = jax.random.split(key)
    bound = 1.0 / math.sqrt(fan_in)
    w = jax.random.uniform(kw, (fan_in, fan_out), jnp.float32, -bound, bound)
    b = jax.random.uniform(kb, (fan_out,), jnp.float32, -bound, bound)
    return w, b


def build_params(key, input_dim, hidden_dim, output_dim, heads):
    keys = jax.random.split(key, 32)
    ki = iter(keys)
    p = {}
    p["nft_w"], p["nft_b"] = _init_linear(next(ki), input_dim, hidden_dim)
    p["ln_g"] = jnp.ones((hidden_dim,), jnp.float32)
    p["ln_b"] = jnp.zeros((hidden_dim,), jnp.float32)
    for name in ("conv1", "conv2", "conv3"):
        wt, bt = _init_linear(next(ki), hidden_dim, hidden_dim)
        wa, ba = _init_linear(next(ki), hidden_dim, 1)
        p[name] = {"w_theta": wt, "b_theta": bt, "w_att": wa, "b_att": ba}
    p["refine_w"], p["refine_b"] = _init_linear(next(ki), hidden_dim, hidden_dim)
    p["att_heads"] = []
    head_dim = hidden_dim // heads
    for _ in range(heads):
        w1, b1 = _init_linear(next(ki), hidden_dim, head_dim)
        w2, b2 = _init_linear(next(ki), head_dim, 1)
        p["att_heads"].append({"w1": w1, "b1": b1, "w2": w2, "b2": b2})
    p["fe_w1"], p["fe_b1"] = _init_linear(next(ki), hidden_dim, hidden_dim)
    p["fe_w2"], p["fe_b2"] = _init_linear(next(ki), hidden_dim, hidden_dim)
    p["fc_w"], p["fc_b"] = _init_linear(next(ki), hidden_dim, output_dim)
    return p


def prepare_params(p, hidden_dim, heads):
    """One-time preprocessing: bf16 weight cast, bias rows, BN-scale folding,
    batched / collapsed multi-head attention matrices."""
    bf16, f32 = jnp.bfloat16, jnp.float32

    def row(b):
        return jnp.asarray(b, f32).reshape(1, -1)

    # Batched MHA first linears: concat horizontally -> one (Dh, Dh) matmul.
    w_mh1 = jnp.concatenate([h["w1"] for h in p["att_heads"]], axis=1)
    b_mh1 = jnp.concatenate([h["b1"] for h in p["att_heads"]], axis=0)
    # Block-diagonal second linears + head-mean collapse exactly to one (1, Dh)
    # lane-reduce vector (pre-scaled by 1/heads) and a scalar bias term.
    w2_flat = jnp.concatenate([h["w2"][:, 0] for h in p["att_heads"]], axis=0)
    w_mh2 = (w2_flat / float(heads)).reshape(1, -1)              # (1, Dh)
    b_mh2 = jnp.mean(
        jnp.stack([h["b2"][0] for h in p["att_heads"]])).reshape(1, 1)

    def theta(name):
        # Eval-mode BatchNorm scale folded into the conv theta weight/bias.
        w = (p[name]["w_theta"] * _BN_SCALE).astype(bf16)
        b = row(p[name]["b_theta"] * _BN_SCALE)
        return w, b

    w_t1, b_t1 = theta("conv1")
    w_t2, b_t2 = theta("conv2")
    w_t3, b_t3 = theta("conv3")

    return (
        p["nft_w"].astype(bf16), row(p["nft_b"]),
        row(p["ln_g"]), row(p["ln_b"]),
        w_t1, b_t1, w_t2, b_t2, w_t3, b_t3,
        p["conv3"]["w_att"].T.astype(f32),      # (1, Dh): used as a VPU reduce
        row(p["conv3"]["b_att"]),
        p["refine_w"].astype(bf16), row(p["refine_b"]),
        w_mh1.astype(bf16), row(b_mh1),
        w_mh2.astype(f32), b_mh2.astype(f32),   # VPU lane-reduce vector/scalar
        p["fe_w1"].astype(bf16), row(p["fe_b1"]),
        p["fe_w2"].astype(bf16), row(p["fe_b2"]),
        (p["fc_w"] * _BN_SCALE).astype(f32),    # epilogue eval-BN folded in
        row(p["fc_b"]),
    )


if __name__ == "__main__":
    INPUT_DIM, HIDDEN_DIM, OUTPUT_DIM, HEADS = 16, 32, 1, 4
    N_V, N_E = 16, 8

    key = jax.random.PRNGKey(0)
    k_x, k_h, k_p = jax.random.split(key, 3)

    # node features (|V|, input_dim)
    X = jax.random.normal(k_x, (N_V, INPUT_DIM), jnp.float32)

    # deterministic hypergraph incidence matrix (|V|, |E|), every row/col nonzero
    H = (jax.random.uniform(k_h, (N_V, N_E)) < 0.35).astype(jnp.float32)
    guarantee = (jnp.arange(N_V)[:, None] % N_E == jnp.arange(N_E)[None, :])
    H = jnp.maximum(H, guarantee.astype(jnp.float32))

    params = build_params(k_p, INPUT_DIM, HIDDEN_DIM, OUTPUT_DIM, HEADS)
    flat = prepare_params(params, HIDDEN_DIM, HEADS)

    root_cause_score, final_attention = hgnnp_forward(
        X, H, flat, output_dim=OUTPUT_DIM)
    jax.block_until_ready((root_cause_score, final_attention))

    assert root_cause_score.shape == (N_E, OUTPUT_DIM)
    assert final_attention.shape == (N_E, 1)
    assert bool(jnp.all(jnp.isfinite(root_cause_score)))
    assert bool(jnp.all(jnp.isfinite(final_attention)))
    assert bool(jnp.all((final_attention > 0.0) & (final_attention < 1.0)))
    print("KERNEL_OK")
</pallas_src>

<mosaic_0001>
module attributes {stable_mosaic.version = 11 : i64} {
  func.func @_hgnnp_fused_kernel(%arg0: i32, %arg1: memref<16x16xf32, #tpu.memory_space<vmem>>, %arg2: memref<16x8xbf16, #tpu.memory_space<vmem>>, %arg3: memref<8x16xbf16, #tpu.memory_space<vmem>>, %arg4: memref<16x32xbf16, #tpu.memory_space<vmem>>, %arg5: memref<1x32xf32, #tpu.memory_space<vmem>>, %arg6: memref<1x32xf32, #tpu.memory_space<vmem>>, %arg7: memref<1x32xf32, #tpu.memory_space<vmem>>, %arg8: memref<32x32xbf16, #tpu.memory_space<vmem>>, %arg9: memref<1x32xf32, #tpu.memory_space<vmem>>, %arg10: memref<32x32xbf16, #tpu.memory_space<vmem>>, %arg11: memref<1x32xf32, #tpu.memory_space<vmem>>, %arg12: memref<32x32xbf16, #tpu.memory_space<vmem>>, %arg13: memref<1x32xf32, #tpu.memory_space<vmem>>, %arg14: memref<1x32xf32, #tpu.memory_space<vmem>>, %arg15: memref<1x1xf32, #tpu.memory_space<vmem>>, %arg16: memref<32x32xbf16, #tpu.memory_space<vmem>>, %arg17: memref<1x32xf32, #tpu.memory_space<vmem>>, %arg18: memref<32x32xbf16, #tpu.memory_space<vmem>>, %arg19: memref<1x32xf32, #tpu.memory_space<vmem>>, %arg20: memref<1x32xf32, #tpu.memory_space<vmem>>, %arg21: memref<1x1xf32, #tpu.memory_space<vmem>>, %arg22: memref<32x32xbf16, #tpu.memory_space<vmem>>, %arg23: memref<1x32xf32, #tpu.memory_space<vmem>>, %arg24: memref<32x32xbf16, #tpu.memory_space<vmem>>, %arg25: memref<1x32xf32, #tpu.memory_space<vmem>>, %arg26: memref<32x1xf32, #tpu.memory_space<vmem>>, %arg27: memref<1x1xf32, #tpu.memory_space<vmem>>, %arg28: memref<8x2xf32, #tpu.memory_space<vmem>>) attributes {dimension_semantics = [#tpu.dimension_semantics<arbitrary>], iteration_bounds = array<i64: 1>, scalar_prefetch = 0 : i64, scratch_operands = 0 : i64, tpu.core_type = #tpu.core_type<tc>, window_params = [{pipeline_mode = #tpu.pipeline_mode<synchronous>, transform_indices = @transform_0, window_bounds = array<i64: 16, 16>}, {pipeline_mode = #tpu.pipeline_mode<synchronous>, transform_indices = @transform_1, window_bounds = array<i64: 16, 8>}, {pipeline_mode = #tpu.pipeline_mode<synchronous>, transform_indices = @transform_2, window_bounds = array<i64: 8, 16>}, {pipeline_mode = #tpu.pipeline_mode<synchronous>, transform_indices = @transform_3, window_bounds = array<i64: 16, 32>}, {pipeline_mode = #tpu.pipeline_mode<synchronous>, transform_indices = @transform_4, window_bounds = array<i64: 1, 32>}, {pipeline_mode = #tpu.pipeline_mode<synchronous>, transform_indices = @transform_5, window_bounds = array<i64: 1, 32>}, {pipeline_mode = #tpu.pipeline_mode<synchronous>, transform_indices = @transform_6, window_bounds = array<i64: 1, 32>}, {pipeline_mode = #tpu.pipeline_mode<synchronous>, transform_indices = @transform_7, window_bounds = array<i64: 32, 32>}, {pipeline_mode = #tpu.pipeline_mode<synchronous>, transform_indices = @transform_8, window_bounds = array<i64: 1, 32>}, {pipeline_mode = #tpu.pipeline_mode<synchronous>, transform_indices = @transform_9, window_bounds = array<i64: 32, 32>}, {pipeline_mode = #tpu.pipeline_mode<synchronous>, transform_indices = @transform_10, window_bounds = array<i64: 1, 32>}, {pipeline_mode = #tpu.pipeline_mode<synchronous>, transform_indices = @transform_11, window_bounds = array<i64: 32, 32>}, {pipeline_mode = #tpu.pipeline_mode<synchronous>, transform_indices = @transform_12, window_bounds = array<i64: 1, 32>}, {pipeline_mode = #tpu.pipeline_mode<synchronous>, transform_indices = @transform_13, window_bounds = array<i64: 1, 32>}, {pipeline_mode = #tpu.pipeline_mode<synchronous>, transform_indices = @transform_14, window_bounds = array<i64: 1, 1>}, {pipeline_mode = #tpu.pipeline_mode<synchronous>, transform_indices = @transform_15, window_bounds = array<i64: 32, 32>}, {pipeline_mode = #tpu.pipeline_mode<synchronous>, transform_indices = @transform_16, window_bounds = array<i64: 1, 32>}, {pipeline_mode = #tpu.pipeline_mode<synchronous>, transform_indices = @transform_17, window_bounds = array<i64: 32, 32>}, {pipeline_mode = #tpu.pipeline_mode<synchronous>, transform_indices = @transform_18, window_bounds = array<i64: 1, 32>}, {pipeline_mode = #tpu.pipeline_mode<synchronous>, transform_indices = @transform_19, window_bounds = array<i64: 1, 32>}, {pipeline_mode = #tpu.pipeline_mode<synchronous>, transform_indices = @transform_20, window_bounds = array<i64: 1, 1>}, {pipeline_mode = #tpu.pipeline_mode<synchronous>, transform_indices = @transform_21, window_bounds = array<i64: 32, 32>}, {pipeline_mode = #tpu.pipeline_mode<synchronous>, transform_indices = @transform_22, window_bounds = array<i64: 1, 32>}, {pipeline_mode = #tpu.pipeline_mode<synchronous>, transform_indices = @transform_23, window_bounds = array<i64: 32, 32>}, {pipeline_mode = #tpu.pipeline_mode<synchronous>, transform_indices = @transform_24, window_bounds = array<i64: 1, 32>}, {pipeline_mode = #tpu.pipeline_mode<synchronous>, transform_indices = @transform_25, window_bounds = array<i64: 32, 1>}, {pipeline_mode = #tpu.pipeline_mode<synchronous>, transform_indices = @transform_26, window_bounds = array<i64: 1, 1>}, {pipeline_mode = #tpu.pipeline_mode<synchronous>, transform_indices = @transform_27, window_bounds = array<i64: 8, 2>}]} {
    %c0 = arith.constant 0 : index
    %c0_0 = arith.constant 0 : index
    %0 = vector.load %arg2[%c0, %c0_0] : memref<16x8xbf16, #tpu.memory_space<vmem>>, vector<16x8xbf16>
    %c0_1 = arith.constant 0 : index
    %c0_2 = arith.constant 0 : index
    %1 = vector.load %arg3[%c0_1, %c0_2] : memref<8x16xbf16, #tpu.memory_space<vmem>>, vector<8x16xbf16>
    %c0_3 = arith.constant 0 : index
    %c0_4 = arith.constant 0 : index
    %2 = vector.load %arg1[%c0_3, %c0_4] : memref<16x16xf32, #tpu.memory_space<vmem>>, vector<16x16xf32>
    %c0_5 = arith.constant 0 : index
    %c0_6 = arith.constant 0 : index
    %3 = vector.load %arg4[%c0_5, %c0_6] : memref<16x32xbf16, #tpu.memory_space<vmem>>, vector<16x32xbf16>
    %4 = arith.truncf %2 : vector<16x16xf32> to vector<16x16xbf16>
    %cst = arith.constant dense<0.000000e+00> : vector<16x32xf32>
    %5 = tpu.matmul %4, %3, %cst {dimension_numbers = #tpu.dot_dimension_numbers<[1], [0], [0], [1], [0, 0, 1, 1], [], []>} : vector<16x16xbf16>, vector<16x32xbf16>, vector<16x32xf32> -> vector<16x32xf32>
    %c0_7 = arith.constant 0 : index
    %c0_8 = arith.constant 0 : index
    %6 = vector.load %arg5[%c0_7, %c0_8] : memref<1x32xf32, #tpu.memory_space<vmem>>, vector<1x32xf32>
    %7 = vector.broadcast %6 : vector<1x32xf32> to vector<16x32xf32>
    %8 = arith.addf %5, %7 : vector<16x32xf32>
    %cst_9 = arith.constant 0.636619746 : f32
    %9 = math.sqrt %cst_9 : f32
    %cst_10 = arith.constant 5.000000e-01 : f32
    %10 = vector.broadcast %cst_10 : f32 to vector<16x32xf32>
    %11 = arith.mulf %10, %8 : vector<16x32xf32>
    %cst_11 = arith.constant 4.471500e-02 : f32
    %12 = vector.broadcast %cst_11 : f32 to vector<16x32xf32>
    %13 = arith.mulf %12, %8 : vector<16x32xf32>
    %14 = arith.mulf %13, %8 : vector<16x32xf32>
    %15 = arith.mulf %14, %8 : vector<16x32xf32>
    %16 = arith.addf %8, %15 : vector<16x32xf32>
    %17 = vector.broadcast %9 : f32 to vector<16x32xf32>
    %18 = arith.mulf %17, %16 : vector<16x32xf32>
    %19 = math.tanh %18 : vector<16x32xf32>
    %cst_12 = arith.constant 1.000000e+00 : f32
    %20 = vector.broadcast %cst_12 : f32 to vector<16x32xf32>
    %21 = arith.addf %20, %19 : vector<16x32xf32>
    %22 = arith.mulf %11, %21 : vector<16x32xf32>
    %cst_13 = arith.constant dense<0.000000e+00> : vector<16xf32>
    %23 = vector.multi_reduction <add>, %22, %cst_13 [1] : vector<16x32xf32> to vector<16xf32>
    %24 = vector.shape_cast %23 : vector<16xf32> to vector<16x1xf32>
    %cst_14 = arith.constant 3.200000e+01 : f32
    %25 = vector.broadcast %cst_14 : f32 to vector<16x1xf32>
    %26 = arith.divf %24, %25 : vector<16x1xf32>
    %27 = vector.broadcast %26 : vector<16x1xf32> to vector<16x32xf32>
    %28 = arith.subf %22, %27 : vector<16x32xf32>
    %29 = vector.broadcast %26 : vector<16x1xf32> to vector<16x32xf32>
    %30 = arith.subf %22, %29 : vector<16x32xf32>
    %31 = arith.mulf %28, %30 : vector<16x32xf32>
    %cst_15 = arith.constant dense<0.000000e+00> : vector<16xf32>
    %32 = vector.multi_reduction <add>, %31, %cst_15 [1] : vector<16x32xf32> to vector<16xf32>
    %33 = vector.shape_cast %32 : vector<16xf32> to vector<16x1xf32>
    %cst_16 = arith.constant 3.200000e+01 : f32
    %34 = vector.broadcast %cst_16 : f32 to vector<16x1xf32>
    %35 = arith.divf %33, %34 : vector<16x1xf32>
    %36 = vector.broadcast %26 : vector<16x1xf32> to vector<16x32xf32>
    %37 = arith.subf %22, %36 : vector<16x32xf32>
    %cst_17 = arith.constant 9.99999974E-6 : f32
    %38 = vector.broadcast %cst_17 : f32 to vector<16x1xf32>
    %39 = arith.addf %35, %38 : vector<16x1xf32>
    %40 = math.rsqrt %39 : vector<16x1xf32>
    %41 = vector.broadcast %40 : vector<16x1xf32> to vector<16x32xf32>
    %42 = arith.mulf %37, %41 : vector<16x32xf32>
    %c0_18 = arith.constant 0 : index
    %c0_19 = arith.constant 0 : index
    %43 = vector.load %arg6[%c0_18, %c0_19] : memref<1x32xf32, #tpu.memory_space<vmem>>, vector<1x32xf32>
    %44 = vector.broadcast %43 : vector<1x32xf32> to vector<16x32xf32>
    %45 = arith.mulf %42, %44 : vector<16x32xf32>
    %c0_20 = arith.constant 0 : index
    %c0_21 = arith.constant 0 : index
    %46 = vector.load %arg7[%c0_20, %c0_21] : memref<1x32xf32, #tpu.memory_space<vmem>>, vector<1x32xf32>
    %47 = vector.broadcast %46 : vector<1x32xf32> to vector<16x32xf32>
    %48 = arith.addf %45, %47 : vector<16x32xf32>
    %c0_22 = arith.constant 0 : index
    %c0_23 = arith.constant 0 : index
    %49 = vector.load %arg8[%c0_22, %c0_23] : memref<32x32xbf16, #tpu.memory_space<vmem>>, vector<32x32xbf16>
    %50 = arith.truncf %48 : vector<16x32xf32> to vector<16x32xbf16>
    %cst_24 = arith.constant dense<0.000000e+00> : vector<16x32xf32>
    %51 = tpu.matmul %50, %49, %cst_24 {dimension_numbers = #tpu.dot_dimension_numbers<[1], [0], [0], [1], [0, 0, 1, 1], [], []>} : vector<16x32xbf16>, vector<32x32xbf16>, vector<16x32xf32> -> vector<16x32xf32>
    %c0_25 = arith.constant 0 : index
    %c0_26 = arith.constant 0 : index
    %52 = vector.load %arg9[%c0_25, %c0_26] : memref<1x32xf32, #tpu.memory_space<vmem>>, vector<1x32xf32>
    %53 = vector.broadcast %52 : vector<1x32xf32> to vector<16x32xf32>
    %54 = arith.addf %51, %53 : vector<16x32xf32>
    %55 = arith.truncf %54 : vector<16x32xf32> to vector<16x32xbf16>
    %cst_27 = arith.constant dense<0.000000e+00> : vector<8x32xf32>
    %56 = tpu.matmul %1, %55, %cst_27 {dimension_numbers = #tpu.dot_dimension_numbers<[1], [0], [0], [1], [0, 0, 1, 1], [], []>} : vector<8x16xbf16>, vector<16x32xbf16>, vector<8x32xf32> -> vector<8x32xf32>
    %57 = arith.truncf %56 : vector<8x32xf32> to vector<8x32xbf16>
    %cst_28 = arith.constant dense<0.000000e+00> : vector<16x32xf32>
    %58 = tpu.matmul %0, %57, %cst_28 {dimension_numbers = #tpu.dot_dimension_numbers<[1], [0], [0], [1], [0, 0, 1, 1], [], []>} : vector<16x8xbf16>, vector<8x32xbf16>, vector<16x32xf32> -> vector<16x32xf32>
    %59 = arith.addf %58, %48 : vector<16x32xf32>
    %cst_29 = arith.constant 0.636619746 : f32
    %60 = math.sqrt %cst_29 : f32
    %cst_30 = arith.constant 5.000000e-01 : f32
    %61 = vector.broadcast %cst_30 : f32 to vector<16x32xf32>
    %62 = arith.mulf %61, %59 : vector<16x32xf32>
    %cst_31 = arith.constant 4.471500e-02 : f32
    %63 = vector.broadcast %cst_31 : f32 to vector<16x32xf32>
    %64 = arith.mulf %63, %59 : vector<16x32xf32>
    %65 = arith.mulf %64, %59 : vector<16x32xf32>
    %66 = arith.mulf %65, %59 : vector<16x32xf32>
    %67 = arith.addf %59, %66 : vector<16x32xf32>
    %68 = vector.broadcast %60 : f32 to vector<16x32xf32>
    %69 = arith.mulf %68, %67 : vector<16x32xf32>
    %70 = math.tanh %69 : vector<16x32xf32>
    %cst_32 = arith.constant 1.000000e+00 : f32
    %71 = vector.broadcast %cst_32 : f32 to vector<16x32xf32>
    %72 = arith.addf %71, %70 : vector<16x32xf32>
    %73 = arith.mulf %62, %72 : vector<16x32xf32>
    %c0_33 = arith.constant 0 : index
    %c0_34 = arith.constant 0 : index
    %74 = vector.load %arg10[%c0_33, %c0_34] : memref<32x32xbf16, #tpu.memory_space<vmem>>, vector<32x32xbf16>
    %75 = arith.truncf %73 : vector<16x32xf32> to vector<16x32xbf16>
    %cst_35 = arith.constant dense<0.000000e+00> : vector<16x32xf32>
    %76 = tpu.matmul %75, %74, %cst_35 {dimension_numbers = #tpu.dot_dimension_numbers<[1], [0], [0], [1], [0, 0, 1, 1], [], []>} : vector<16x32xbf16>, vector<32x32xbf16>, vector<16x32xf32> -> vector<16x32xf32>
    %c0_36 = arith.constant 0 : index
    %c0_37 = arith.constant 0 : index
    %77 = vector.load %arg11[%c0_36, %c0_37] : memref<1x32xf32, #tpu.memory_space<vmem>>, vector<1x32xf32>
    %78 = vector.broadcast %77 : vector<1x32xf32> to vector<16x32xf32>
    %79 = arith.addf %76, %78 : vector<16x32xf32>
    %80 = arith.truncf %79 : vector<16x32xf32> to vector<16x32xbf16>
    %cst_38 = arith.constant dense<0.000000e+00> : vector<8x32xf32>
    %81 = tpu.matmul %1, %80, %cst_38 {dimension_numbers = #tpu.dot_dimension_numbers<[1], [0], [0], [1], [0, 0, 1, 1], [], []>} : vector<8x16xbf16>, vector<16x32xbf16>, vector<8x32xf32> -> vector<8x32xf32>
    %82 = arith.addf %81, %56 : vector<8x32xf32>
    %83 = arith.truncf %82 : vector<8x32xf32> to vector<8x32xbf16>
    %cst_39 = arith.constant dense<0.000000e+00> : vector<16x32xf32>
    %84 = tpu.matmul %0, %83, %cst_39 {dimension_numbers = #tpu.dot_dimension_numbers<[1], [0], [0], [1], [0, 0, 1, 1], [], []>} : vector<16x8xbf16>, vector<8x32xbf16>, vector<16x32xf32> -> vector<16x32xf32>
    %85 = arith.addf %84, %73 : vector<16x32xf32>
    %cst_40 = arith.constant 0.636619746 : f32
    %86 = math.sqrt %cst_40 : f32
    %cst_41 = arith.constant 5.000000e-01 : f32
    %87 = vector.broadcast %cst_41 : f32 to vector<16x32xf32>
    %88 = arith.mulf %87, %85 : vector<16x32xf32>
    %cst_42 = arith.constant 4.471500e-02 : f32
    %89 = vector.broadcast %cst_42 : f32 to vector<16x32xf32>
    %90 = arith.mulf %89, %85 : vector<16x32xf32>
    %91 = arith.mulf %90, %85 : vector<16x32xf32>
    %92 = arith.mulf %91, %85 : vector<16x32xf32>
    %93 = arith.addf %85, %92 : vector<16x32xf32>
    %94 = vector.broadcast %86 : f32 to vector<16x32xf32>
    %95 = arith.mulf %94, %93 : vector<16x32xf32>
    %96 = math.tanh %95 : vector<16x32xf32>
    %cst_43 = arith.constant 1.000000e+00 : f32
    %97 = vector.broadcast %cst_43 : f32 to vector<16x32xf32>
    %98 = arith.addf %97, %96 : vector<16x32xf32>
    %99 = arith.mulf %88, %98 : vector<16x32xf32>
    %c0_44 = arith.constant 0 : index
    %c0_45 = arith.constant 0 : index
    %100 = vector.load %arg12[%c0_44, %c0_45] : memref<32x32xbf16, #tpu.memory_space<vmem>>, vector<32x32xbf16>
    %101 = arith.truncf %99 : vector<16x32xf32> to vector<16x32xbf16>
    %cst_46 = arith.constant dense<0.000000e+00> : vector<16x32xf32>
    %102 = tpu.matmul %101, %100, %cst_46 {dimension_numbers = #tpu.dot_dimension_numbers<[1], [0], [0], [1], [0, 0, 1, 1], [], []>} : vector<16x32xbf16>, vector<32x32xbf16>, vector<16x32xf32> -> vector<16x32xf32>
    %c0_47 = arith.constant 0 : index
    %c0_48 = arith.constant 0 : index
    %103 = vector.load %arg13[%c0_47, %c0_48] : memref<1x32xf32, #tpu.memory_space<vmem>>, vector<1x32xf32>
    %104 = vector.broadcast %103 : vector<1x32xf32> to vector<16x32xf32>
    %105 = arith.addf %102, %104 : vector<16x32xf32>
    %106 = arith.truncf %105 : vector<16x32xf32> to vector<16x32xbf16>
    %cst_49 = arith.constant dense<0.000000e+00> : vector<8x32xf32>
    %107 = tpu.matmul %1, %106, %cst_49 {dimension_numbers = #tpu.dot_dimension_numbers<[1], [0], [0], [1], [0, 0, 1, 1], [], []>} : vector<8x16xbf16>, vector<16x32xbf16>, vector<8x32xf32> -> vector<8x32xf32>
    %108 = arith.addf %107, %82 : vector<8x32xf32>
    %c0_50 = arith.constant 0 : index
    %c0_51 = arith.constant 0 : index
    %109 = vector.load %arg14[%c0_50, %c0_51] : memref<1x32xf32, #tpu.memory_space<vmem>>, vector<1x32xf32>
    %110 = vector.broadcast %109 : vector<1x32xf32> to vector<8x32xf32>
    %111 = arith.mulf %108, %110 : vector<8x32xf32>
    %cst_52 = arith.constant dense<0.000000e+00> : vector<8xf32>
    %112 = vector.multi_reduction <add>, %111, %cst_52 [1] : vector<8x32xf32> to vector<8xf32>
    %113 = vector.shape_cast %112 : vector<8xf32> to vector<8x1xf32>
    %c0_53 = arith.constant 0 : index
    %c0_54 = arith.constant 0 : index
    %114 = vector.load %arg15[%c0_53, %c0_54] : memref<1x1xf32, #tpu.memory_space<vmem>>, vector<1x1xf32>
    %115 = vector.broadcast %114 : vector<1x1xf32> to vector<8x1xf32>
    %116 = arith.addf %113, %115 : vector<8x1xf32>
    %117 = arith.negf %116 : vector<8x1xf32>
    %118 = math.exp %117 : vector<8x1xf32>
    %cst_55 = arith.constant 1.000000e+00 : f32
    %119 = vector.broadcast %cst_55 : f32 to vector<8x1xf32>
    %120 = arith.addf %119, %118 : vector<8x1xf32>
    %121 = arith.divf %119, %120 : vector<8x1xf32>
    %c0_56 = arith.constant 0 : index
    %c0_57 = arith.constant 0 : index
    %122 = vector.load %arg16[%c0_56, %c0_57] : memref<32x32xbf16, #tpu.memory_space<vmem>>, vector<32x32xbf16>
    %123 = arith.truncf %108 : vector<8x32xf32> to vector<8x32xbf16>
    %cst_58 = arith.constant dense<0.000000e+00> : vector<8x32xf32>
    %124 = tpu.matmul %123, %122, %cst_58 {dimension_numbers = #tpu.dot_dimension_numbers<[1], [0], [0], [1], [0, 0, 1, 1], [], []>} : vector<8x32xbf16>, vector<32x32xbf16>, vector<8x32xf32> -> vector<8x32xf32>
    %c0_59 = arith.constant 0 : index
    %c0_60 = arith.constant 0 : index
    %125 = vector.load %arg17[%c0_59, %c0_60] : memref<1x32xf32, #tpu.memory_space<vmem>>, vector<1x32xf32>
    %126 = vector.broadcast %125 : vector<1x32xf32> to vector<8x32xf32>
    %127 = arith.addf %124, %126 : vector<8x32xf32>
    %cst_61 = arith.constant 0.636619746 : f32
    %128 = math.sqrt %cst_61 : f32
    %cst_62 = arith.constant 5.000000e-01 : f32
    %129 = vector.broadcast %cst_62 : f32 to vector<8x32xf32>
    %130 = arith.mulf %129, %127 : vector<8x32xf32>
    %cst_63 = arith.constant 4.471500e-02 : f32
    %131 = vector.broadcast %cst_63 : f32 to vector<8x32xf32>
    %132 = arith.mulf %131, %127 : vector<8x32xf32>
    %133 = arith.mulf %132, %127 : vector<8x32xf32>
    %134 = arith.mulf %133, %127 : vector<8x32xf32>
    %135 = arith.addf %127, %134 : vector<8x32xf32>
    %136 = vector.broadcast %128 : f32 to vector<8x32xf32>
    %137 = arith.mulf %136, %135 : vector<8x32xf32>
    %138 = math.tanh %137 : vector<8x32xf32>
    %cst_64 = arith.constant 1.000000e+00 : f32
    %139 = vector.broadcast %cst_64 : f32 to vector<8x32xf32>
    %140 = arith.addf %139, %138 : vector<8x32xf32>
    %141 = arith.mulf %130, %140 : vector<8x32xf32>
    %c0_65 = arith.constant 0 : index
    %c0_66 = arith.constant 0 : index
    %142 = vector.load %arg18[%c0_65, %c0_66] : memref<32x32xbf16, #tpu.memory_space<vmem>>, vector<32x32xbf16>
    %143 = arith.truncf %141 : vector<8x32xf32> to vector<8x32xbf16>
    %cst_67 = arith.constant dense<0.000000e+00> : vector<8x32xf32>
    %144 = tpu.matmul %143, %142, %cst_67 {dimension_numbers = #tpu.dot_dimension_numbers<[1], [0], [0], [1], [0, 0, 1, 1], [], []>} : vector<8x32xbf16>, vector<32x32xbf16>, vector<8x32xf32> -> vector<8x32xf32>
    %c0_68 = arith.constant 0 : index
    %c0_69 = arith.constant 0 : index
    %145 = vector.load %arg19[%c0_68, %c0_69] : memref<1x32xf32, #tpu.memory_space<vmem>>, vector<1x32xf32>
    %146 = vector.broadcast %145 : vector<1x32xf32> to vector<8x32xf32>
    %147 = arith.addf %144, %146 : vector<8x32xf32>
    %cst_70 = arith.constant 0.636619746 : f32
    %148 = math.sqrt %cst_70 : f32
    %cst_71 = arith.constant 5.000000e-01 : f32
    %149 = vector.broadcast %cst_71 : f32 to vector<8x32xf32>
    %150 = arith.mulf %149, %147 : vector<8x32xf32>
    %cst_72 = arith.constant 4.471500e-02 : f32
    %151 = vector.broadcast %cst_72 : f32 to vector<8x32xf32>
    %152 = arith.mulf %151, %147 : vector<8x32xf32>
    %153 = arith.mulf %152, %147 : vector<8x32xf32>
    %154 = arith.mulf %153, %147 : vector<8x32xf32>
    %155 = arith.addf %147, %154 : vector<8x32xf32>
    %156 = vector.broadcast %148 : f32 to vector<8x32xf32>
    %157 = arith.mulf %156, %155 : vector<8x32xf32>
    %158 = math.tanh %157 : vector<8x32xf32>
    %cst_73 = arith.constant 1.000000e+00 : f32
    %159 = vector.broadcast %cst_73 : f32 to vector<8x32xf32>
    %160 = arith.addf %159, %158 : vector<8x32xf32>
    %161 = arith.mulf %150, %160 : vector<8x32xf32>
    %c0_74 = arith.constant 0 : index
    %c0_75 = arith.constant 0 : index
    %162 = vector.load %arg20[%c0_74, %c0_75] : memref<1x32xf32, #tpu.memory_space<vmem>>, vector<1x32xf32>
    %163 = vector.broadcast %162 : vector<1x32xf32> to vector<8x32xf32>
    %164 = arith.mulf %161, %163 : vector<8x32xf32>
    %cst_76 = arith.constant dense<0.000000e+00> : vector<8xf32>
    %165 = vector.multi_reduction <add>, %164, %cst_76 [1] : vector<8x32xf32> to vector<8xf32>
    %166 = vector.shape_cast %165 : vector<8xf32> to vector<8x1xf32>
    %c0_77 = arith.constant 0 : index
    %c0_78 = arith.constant 0 : index
    %167 = vector.load %arg21[%c0_77, %c0_78] : memref<1x1xf32, #tpu.memory_space<vmem>>, vector<1x1xf32>
    %168 = vector.broadcast %167 : vector<1x1xf32> to vector<8x1xf32>
    %169 = arith.addf %166, %168 : vector<8x1xf32>
    %170 = arith.negf %169 : vector<8x1xf32>
    %171 = math.exp %170 : vector<8x1xf32>
    %cst_79 = arith.constant 1.000000e+00 : f32
    %172 = vector.broadcast %cst_79 : f32 to vector<8x1xf32>
    %173 = arith.addf %172, %171 : vector<8x1xf32>
    %174 = arith.divf %172, %173 : vector<8x1xf32>
    %175 = arith.addf %174, %121 : vector<8x1xf32>
    %cst_80 = arith.constant 5.000000e-01 : f32
    %176 = vector.broadcast %cst_80 : f32 to vector<8x1xf32>
    %177 = arith.mulf %175, %176 : vector<8x1xf32>
    %178 = vector.broadcast %177 : vector<8x1xf32> to vector<8x32xf32>
    %179 = arith.mulf %141, %178 : vector<8x32xf32>
    %c0_81 = arith.constant 0 : index
    %c0_82 = arith.constant 0 : index
    %180 = vector.load %arg22[%c0_81, %c0_82] : memref<32x32xbf16, #tpu.memory_space<vmem>>, vector<32x32xbf16>
    %181 = arith.truncf %179 : vector<8x32xf32> to vector<8x32xbf16>
    %cst_83 = arith.constant dense<0.000000e+00> : vector<8x32xf32>
    %182 = tpu.matmul %181, %180, %cst_83 {dimension_numbers = #tpu.dot_dimension_numbers<[1], [0], [0], [1], [0, 0, 1, 1], [], []>} : vector<8x32xbf16>, vector<32x32xbf16>, vector<8x32xf32> -> vector<8x32xf32>
    %c0_84 = arith.constant 0 : index
    %c0_85 = arith.constant 0 : index
    %183 = vector.load %arg23[%c0_84, %c0_85] : memref<1x32xf32, #tpu.memory_space<vmem>>, vector<1x32xf32>
    %184 = vector.broadcast %183 : vector<1x32xf32> to vector<8x32xf32>
    %185 = arith.addf %182, %184 : vector<8x32xf32>
    %cst_86 = arith.constant 0.636619746 : f32
    %186 = math.sqrt %cst_86 : f32
    %cst_87 = arith.constant 5.000000e-01 : f32
    %187 = vector.broadcast %cst_87 : f32 to vector<8x32xf32>
    %188 = arith.mulf %187, %185 : vector<8x32xf32>
    %cst_88 = arith.constant 4.471500e-02 : f32
    %189 = vector.broadcast %cst_88 : f32 to vector<8x32xf32>
    %190 = arith.mulf %189, %185 : vector<8x32xf32>
    %191 = arith.mulf %190, %185 : vector<8x32xf32>
    %192 = arith.mulf %191, %185 : vector<8x32xf32>
    %193 = arith.addf %185, %192 : vector<8x32xf32>
    %194 = vector.broadcast %186 : f32 to vector<8x32xf32>
    %195 = arith.mulf %194, %193 : vector<8x32xf32>
    %196 = math.tanh %195 : vector<8x32xf32>
    %cst_89 = arith.constant 1.000000e+00 : f32
    %197 = vector.broadcast %cst_89 : f32 to vector<8x32xf32>
    %198 = arith.addf %197, %196 : vector<8x32xf32>
    %199 = arith.mulf %188, %198 : vector<8x32xf32>
    %c0_90 = arith.constant 0 : index
    %c0_91 = arith.constant 0 : index
    %200 = vector.load %arg24[%c0_90, %c0_91] : memref<32x32xbf16, #tpu.memory_space<vmem>>, vector<32x32xbf16>
    %201 = arith.truncf %199 : vector<8x32xf32> to vector<8x32xbf16>
    %cst_92 = arith.constant dense<0.000000e+00> : vector<8x32xf32>
    %202 = tpu.matmul %201, %200, %cst_92 {dimension_numbers = #tpu.dot_dimension_numbers<[1], [0], [0], [1], [0, 0, 1, 1], [], []>} : vector<8x32xbf16>, vector<32x32xbf16>, vector<8x32xf32> -> vector<8x32xf32>
    %c0_93 = arith.constant 0 : index
    %c0_94 = arith.constant 0 : index
    %203 = vector.load %arg25[%c0_93, %c0_94] : memref<1x32xf32, #tpu.memory_space<vmem>>, vector<1x32xf32>
    %204 = vector.broadcast %203 : vector<1x32xf32> to vector<8x32xf32>
    %205 = arith.addf %202, %204 : vector<8x32xf32>
    %cst_95 = arith.constant 0.636619746 : f32
    %206 = math.sqrt %cst_95 : f32
    %cst_96 = arith.constant 5.000000e-01 : f32
    %207 = vector.broadcast %cst_96 : f32 to vector<8x32xf32>
    %208 = arith.mulf %207, %205 : vector<8x32xf32>
    %cst_97 = arith.constant 4.471500e-02 : f32
    %209 = vector.broadcast %cst_97 : f32 to vector<8x32xf32>
    %210 = arith.mulf %209, %205 : vector<8x32xf32>
    %211 = arith.mulf %210, %205 : vector<8x32xf32>
    %212 = arith.mulf %211, %205 : vector<8x32xf32>
    %213 = arith.addf %205, %212 : vector<8x32xf32>
    %214 = vector.broadcast %206 : f32 to vector<8x32xf32>
    %215 = arith.mulf %214, %213 : vector<8x32xf32>
    %216 = math.tanh %215 : vector<8x32xf32>
    %cst_98 = arith.constant 1.000000e+00 : f32
    %217 = vector.broadcast %cst_98 : f32 to vector<8x32xf32>
    %218 = arith.addf %217, %216 : vector<8x32xf32>
    %219 = arith.mulf %208, %218 : vector<8x32xf32>
    %220 = arith.addf %219, %179 : vector<8x32xf32>
    %c0_99 = arith.constant 0 : index
    %c0_100 = arith.constant 0 : index
    %221 = vector.load %arg26[%c0_99, %c0_100] : memref<32x1xf32, #tpu.memory_space<vmem>>, vector<32x1xf32>
    %cst_101 = arith.constant dense<0.000000e+00> : vector<8x1xf32>
    %222 = tpu.matmul %220, %221, %cst_101 {dimension_numbers = #tpu.dot_dimension_numbers<[1], [0], [0], [1], [0, 0, 1, 1], [], []>} : vector<8x32xf32>, vector<32x1xf32>, vector<8x1xf32> -> vector<8x1xf32>
    %c0_102 = arith.constant 0 : index
    %c0_103 = arith.constant 0 : index
    %223 = vector.load %arg27[%c0_102, %c0_103] : memref<1x1xf32, #tpu.memory_space<vmem>>, vector<1x1xf32>
    %224 = vector.broadcast %223 : vector<1x1xf32> to vector<8x1xf32>
    %225 = arith.addf %222, %224 : vector<8x1xf32>
    %226 = arith.negf %225 : vector<8x1xf32>
    %227 = math.exp %226 : vector<8x1xf32>
    %cst_104 = arith.constant 1.000000e+00 : f32
    %228 = vector.broadcast %cst_104 : f32 to vector<8x1xf32>
    %229 = arith.addf %228, %227 : vector<8x1xf32>
    %230 = arith.divf %228, %229 : vector<8x1xf32>
    %231 = tpu.concatenate %230, %177 in 1 : vector<8x1xf32>, vector<8x1xf32> -> vector<8x2xf32>
    %c0_105 = arith.constant 0 : index
    %c0_106 = arith.constant 0 : index
    %232 = vector.load %arg28[%c0_105, %c0_106] : memref<8x2xf32, #tpu.memory_space<vmem>>, vector<8x2xf32>
    tpu.vector_store %arg28[%c0_105, %c0_106], %231 {strides = array<i32>} : memref<8x2xf32, #tpu.memory_space<vmem>>, vector<8x2xf32>,
    return
  }
  func.func @transform_0(%arg0: i32) -> (i32, i32) {
    %c0_i32 = arith.constant 0 : i32
    %c0_i32_0 = arith.constant 0 : i32
    %c0_i32_1 = arith.constant 0 : i32
    return %c0_i32, %c0_i32_0 : i32, i32
  }
  func.func @transform_1(%arg0: i32) -> (i32, i32) {
    %c0_i32 = arith.constant 0 : i32
    %c0_i32_0 = arith.constant 0 : i32
    %c0_i32_1 = arith.constant 0 : i32
    return %c0_i32, %c0_i32_0 : i32, i32
  }
  func.func @transform_2(%arg0: i32) -> (i32, i32) {
    %c0_i32 = arith.constant 0 : i32
    %c0_i32_0 = arith.constant 0 : i32
    %c0_i32_1 = arith.constant 0 : i32
    return %c0_i32, %c0_i32_0 : i32, i32
  }
  func.func @transform_3(%arg0: i32) -> (i32, i32) {
    %c0_i32 = arith.constant 0 : i32
    %c0_i32_0 = arith.constant 0 : i32
    %c0_i32_1 = arith.constant 0 : i32
    return %c0_i32, %c0_i32_0 : i32, i32
  }
  func.func @transform_4(%arg0: i32) -> (i32, i32) {
    %c0_i32 = arith.constant 0 : i32
    %c0_i32_0 = arith.constant 0 : i32
    %c0_i32_1 = arith.constant 0 : i32
    return %c0_i32, %c0_i32_0 : i32, i32
  }
  func.func @transform_5(%arg0: i32) -> (i32, i32) {
    %c0_i32 = arith.constant 0 : i32
    %c0_i32_0 = arith.constant 0 : i32
    %c0_i32_1 = arith.constant 0 : i32
    return %c0_i32, %c0_i32_0 : i32, i32
  }
  func.func @transform_6(%arg0: i32) -> (i32, i32) {
    %c0_i32 = arith.constant 0 : i32
    %c0_i32_0 = arith.constant 0 : i32
    %c0_i32_1 = arith.constant 0 : i32
    return %c0_i32, %c0_i32_0 : i32, i32
  }
  func.func @transform_7(%arg0: i32) -> (i32, i32) {
    %c0_i32 = arith.constant 0 : i32
    %c0_i32_0 = arith.constant 0 : i32
    %c0_i32_1 = arith.constant 0 : i32
    return %c0_i32, %c0_i32_0 : i32, i32
  }
  func.func @transform_8(%arg0: i32) -> (i32, i32) {
    %c0_i32 = arith.constant 0 : i32
    %c0_i32_0 = arith.constant 0 : i32
    %c0_i32_1 = arith.constant 0 : i32
    return %c0_i32, %c0_i32_0 : i32, i32
  }
  func.func @transform_9(%arg0: i32) -> (i32, i32) {
    %c0_i32 = arith.constant 0 : i32
    %c0_i32_0 = arith.constant 0 : i32
    %c0_i32_1 = arith.constant 0 : i32
    return %c0_i32, %c0_i32_0 : i32, i32
  }
  func.func @transform_10(%arg0: i32) -> (i32, i32) {
    %c0_i32 = arith.constant 0 : i32
    %c0_i32_0 = arith.constant 0 : i32
    %c0_i32_1 = arith.constant 0 : i32
    return %c0_i32, %c0_i32_0 : i32, i32
  }
  func.func @transform_11(%arg0: i32) -> (i32, i32) {
    %c0_i32 = arith.constant 0 : i32
    %c0_i32_0 = arith.constant 0 : i32
    %c0_i32_1 = arith.constant 0 : i32
    return %c0_i32, %c0_i32_0 : i32, i32
  }
  func.func @transform_12(%arg0: i32) -> (i32, i32) {
    %c0_i32 = arith.constant 0 : i32
    %c0_i32_0 = arith.constant 0 : i32
    %c0_i32_1 = arith.constant 0 : i32
    return %c0_i32, %c0_i32_0 : i32, i32
  }
  func.func @transform_13(%arg0: i32) -> (i32, i32) {
    %c0_i32 = arith.constant 0 : i32
    %c0_i32_0 = arith.constant 0 : i32
    %c0_i32_1 = arith.constant 0 : i32
    return %c0_i32, %c0_i32_0 : i32, i32
  }
  func.func @transform_14(%arg0: i32) -> (i32, i32) {
    %c0_i32 = arith.constant 0 : i32
    %c0_i32_0 = arith.constant 0 : i32
    %c0_i32_1 = arith.constant 0 : i32
    return %c0_i32, %c0_i32_0 : i32, i32
  }
  func.func @transform_15(%arg0: i32) -> (i32, i32) {
    %c0_i32 = arith.constant 0 : i32
    %c0_i32_0 = arith.constant 0 : i32
    %c0_i32_1 = arith.constant 0 : i32
    return %c0_i32, %c0_i32_0 : i32, i32
  }
  func.func @transform_16(%arg0: i32) -> (i32, i32) {
    %c0_i32 = arith.constant 0 : i32
    %c0_i32_0 = arith.constant 0 : i32
    %c0_i32_1 = arith.constant 0 : i32
    return %c0_i32, %c0_i32_0 : i32, i32
  }
  func.func @transform_17(%arg0: i32) -> (i32, i32) {
    %c0_i32 = arith.constant 0 : i32
    %c0_i32_0 = arith.constant 0 : i32
    %c0_i32_1 = arith.constant 0 : i32
    return %c0_i32, %c0_i32_0 : i32, i32
  }
  func.func @transform_18(%arg0: i32) -> (i32, i32) {
    %c0_i32 = arith.constant 0 : i32
    %c0_i32_0 = arith.constant 0 : i32
    %c0_i32_1 = arith.constant 0 : i32
    return %c0_i32, %c0_i32_0 : i32, i32
  }
  func.func @transform_19(%arg0: i32) -> (i32, i32) {
    %c0_i32 = arith.constant 0 : i32
    %c0_i32_0 = arith.constant 0 : i32
    %c0_i32_1 = arith.constant 0 : i32
    return %c0_i32, %c0_i32_0 : i32, i32
  }
  func.func @transform_20(%arg0: i32) -> (i32, i32) {
    %c0_i32 = arith.constant 0 : i32
    %c0_i32_0 = arith.constant 0 : i32
    %c0_i32_1 = arith.constant 0 : i32
    return %c0_i32, %c0_i32_0 : i32, i32
  }
  func.func @transform_21(%arg0: i32) -> (i32, i32) {
    %c0_i32 = arith.constant 0 : i32
    %c0_i32_0 = arith.constant 0 : i32
    %c0_i32_1 = arith.constant 0 : i32
    return %c0_i32, %c0_i32_0 : i32, i32
  }
  func.func @transform_22(%arg0: i32) -> (i32, i32) {
    %c0_i32 = arith.constant 0 : i32
    %c0_i32_0 = arith.constant 0 : i32
    %c0_i32_1 = arith.constant 0 : i32
    return %c0_i32, %c0_i32_0 : i32, i32
  }
  func.func @transform_23(%arg0: i32) -> (i32, i32) {
    %c0_i32 = arith.constant 0 : i32
    %c0_i32_0 = arith.constant 0 : i32
    %c0_i32_1 = arith.constant 0 : i32
    return %c0_i32, %c0_i32_0 : i32, i32
  }
  func.func @transform_24(%arg0: i32) -> (i32, i32) {
    %c0_i32 = arith.constant 0 : i32
    %c0_i32_0 = arith.constant 0 : i32
    %c0_i32_1 = arith.constant 0 : i32
    return %c0_i32, %c0_i32_0 : i32, i32
  }
  func.func @transform_25(%arg0: i32) -> (i32, i32) {
    %c0_i32 = arith.constant 0 : i32
    %c0_i32_0 = arith.constant 0 : i32
    %c0_i32_1 = arith.constant 0 : i32
    return %c0_i32, %c0_i32_0 : i32, i32
  }
  func.func @transform_26(%arg0: i32) -> (i32, i32) {
    %c0_i32 = arith.constant 0 : i32
    %c0_i32_0 = arith.constant 0 : i32
    %c0_i32_1 = arith.constant 0 : i32
    return %c0_i32, %c0_i32_0 : i32, i32
  }
  func.func @transform_27(%arg0: i32) -> (i32, i32) {
    %c0_i32 = arith.constant 0 : i32
    %c0_i32_0 = arith.constant 0 : i32
    %c0_i32_1 = arith.constant 0 : i32
    return %c0_i32, %c0_i32_0 : i32, i32
  }
}

</mosaic_0001>

<bundles_post_ra>
// kernel: tpu_custom_call.1
= control target key start
LH: loop header
LB: loop body
LE: loop exit
PB: predicated region body
PF: predicated region fallthrough
CT: control target
= control target key end

     0   :  { %s1765_s0 = inlined_call_operand.vmem [shape: f32[16,16], index: 0, kind: input, shape index: {}]   ;;  %s1766_s1 = inlined_call_operand.vmem [shape: bf16[16,8], index: 1, kind: input, shape index: {}]   ;;  %s1767_s2 = inlined_call_operand.vmem [shape: bf16[8,16], index: 2, kind: input, shape index: {}]   ;;  %s1768_s3 = inlined_call_operand.vmem [shape: bf16[16,32], index: 3, kind: input, shape index: {}]   ;;  %s1769_s4 = inlined_call_operand.hbm [shape: f32[1,32], index: 4, kind: input, shape index: {}]   ;;  %s1770_s5 = inlined_call_operand.hbm [shape: f32[1,32], index: 5, kind: input, shape index: {}]   ;;  %s1771_s6 = inlined_call_operand.hbm [shape: f32[1,32], index: 6, kind: input, shape index: {}]   ;;  %s1772_s7 = inlined_call_operand.vmem [shape: bf16[32,32], index: 7, kind: input, shape index: {}]   ;;  %s1773_s8 = inlined_call_operand.hbm [shape: f32[1,32], index: 8, kind: input, shape index: {}]   ;;  %s1774_s9 = inlined_call_operand.hbm [shape: bf16[32,32], index: 9, kind: input, shape index: {}]   ;;  %s1775_s10 = inlined_call_operand.hbm [shape: f32[1,32], index: 10, kind: input, shape index: {}]   ;;  %s1776_s11 = inlined_call_operand.hbm [shape: bf16[32,32], index: 11, kind: input, shape index: {}]   ;;  %s1777_s12 = inlined_call_operand.hbm [shape: f32[1,32], index: 12, kind: input, shape index: {}]   ;;  %s1778_s13 = inlined_call_operand.hbm [shape: f32[1,32], index: 13, kind: input, shape index: {}]   ;;  %s1779_s14 = inlined_call_operand.<no memory space> [shape: f32[1,1], index: 14, kind: input, shape index: {}]   ;;  %s1780_s15 = inlined_call_operand.hbm [shape: bf16[32,32], index: 15, kind: input, shape index: {}]   ;;  %s1781_s16 = inlined_call_operand.hbm [shape: f32[1,32], index: 16, kind: input, shape index: {}]   ;;  %s1782_s17 = inlined_call_operand.vmem [shape: bf16[32,32], index: 17, kind: input, shape index: {}]   ;;  %s1783_s18 = inlined_call_operand.vmem [shape: f32[1,32], index: 18, kind: input, shape index: {}]   ;;  %s1784_s19 = inlined_call_operand.vmem [shape: f32[1,32], index: 19, kind: input, shape index: {}]   ;;  %s1785_s21 = inlined_call_operand.hbm [shape: bf16[32,32], index: 21, kind: input, shape index: {}]   ;;  %s1786_s22 = inlined_call_operand.vmem [shape: f32[1,32], index: 22, kind: input, shape index: {}]   ;;  %s1787_s23 = inlined_call_operand.hbm [shape: bf16[32,32], index: 23, kind: input, shape index: {}]   ;;  %s1788_s24 = inlined_call_operand.vmem [shape: f32[1,32], index: 24, kind: input, shape index: {}]   ;;  %s1789_s25 = inlined_call_operand.vmem [shape: f32[32,1], index: 25, kind: input, shape index: {}]   ;;  %s1790_s27 = inlined_call_operand.vmem [shape: f32[8,2], index: 27, kind: output, shape index: {}]   ;;  %s1791_s20 = inlined_call_operand.<no memory space> [shape: f32[1,1], index: 20, kind: input, shape index: {}]   ;;  %s1792_s26 = inlined_call_operand.<no memory space> [shape: f32[1,1], index: 26, kind: input, shape index: {}]  }
   0x1   :  { %1795 = sst [smem:[#allocation32_spill]] %s1765_s0  ;;  %v32_v0 = vstv %s1779_s14  ;;  %v34_v1 = vstv %s1791_s20  ;;  %v36_v2 = vstv %s1792_s26 }
   0x2   :  { %1796 = sst [smem:[#allocation33_spill]] %s1766_s1  ;;  %33 = vst [vmem:[#allocation2] sm:$0x1] %v32_v0 }
   0x3   :  { %1797 = sst [smem:[#allocation34_spill]] %s1767_s2  ;;  %35 = vst [vmem:[#allocation3] sm:$0x1] %v34_v1 }
   0x4   :  { %1798 = sst [smem:[#allocation35_spill]] %s1768_s3  ;;  %37 = vst [vmem:[#allocation4] sm:$0x1] %v36_v2 }
   0x5   :  { %1799 = sst [smem:[#allocation36_spill]] %s1769_s4 }
   0x6   :  { %1800 = sst [smem:[#allocation37_spill]] %s1770_s5 }
   0x7   :  { %1801 = sst [smem:[#allocation38_spill]] %s1771_s6 }
   0x8   :  { %1802 = sst [smem:[#allocation39_spill]] %s1772_s7 }
   0x9   :  { %1803 = sst [smem:[#allocation40_spill]] %s1773_s8 }
   0xa   :  { %1804 = sst [smem:[#allocation41_spill]] %s1774_s9 }
   0xb   :  { %1805 = sst [smem:[#allocation42_spill]] %s1775_s10 }
   0xc   :  { %1806 = sst [smem:[#allocation43_spill]] %s1776_s11 }
   0xd   :  { %38 = vsyncpa [#allocation6], 0 }
   0xe   :  { %39 = vsyncpa [#allocation8], 0 }
   0xf   :  { %40 = vsyncpa [#allocation11], 0 }
  0x10   :  { %41 = vsyncpa [#allocation14], 0 }
  0x11   :  { %42 = vsyncpa [#allocation17], 0 }
  0x12   :  { %43 = vsyncpa [#allocation20], 0  ;;  %s1807_s14 = sld [smem:[#allocation37_spill]] }
  0x18   :  { %s69_s10 = sshll.u32 %s1807_s14, 4  ;;  %s70_s10 = int_to_ptr.hbm [resolvable:$true] %s69_s10 }
  0x19   :  { %44 = vsyncpa [#allocation23], 0  ;;  %s1458_s20 = smov [#allocation7]   ;;  %s1808_s6 = sld [smem:[#allocation40_spill]] }
  0x1a   :  { %s71_s29 = sshll.u32 %s1458_s20, 4  ;;  %s1459_s2 = smov [#allocation10]   ;;  %s72_s29 = int_to_ptr.vmem [resolvable:$true] %s71_s29 }
  0x1b   :  { %74 = dma.hbm_to_vmem [thread:$0]  %s70_s10, 16, %s72_s29, [#allocation8]  }
  0x1c   :  { %s95_s3 = sshll.u32 %s1459_s2, 4  ;;  %s1809_s8 = sld [smem:[#allocation42_spill]]  ;;  %s96_s3 = int_to_ptr.vmem [resolvable:$true] %s95_s3 }
  0x1d   :  { %s141_s28 = sshll.u32 %s1777_s12, 4  ;;  %s1460_s0 = smov [#allocation13]   ;;  %s142_s28 = int_to_ptr.hbm [resolvable:$true] %s141_s28 }
  0x1e   :  { %s119_s14 = sshll.u32 %s1460_s0, 4  ;;  %s1461_s10 = smov [#allocation16]   ;;  %s120_s14 = int_to_ptr.vmem [resolvable:$true] %s119_s14 }
  0x1f   :  { %s93_s11 = sshll.u32 %s1808_s6, 4  ;;  %s143_s20 = sshll.u32 %s1461_s10, 4  ;;  %s94_s11 = int_to_ptr.hbm [resolvable:$true] %s93_s11  ;;  %s144_s20 = int_to_ptr.vmem [resolvable:$true] %s143_s20 }
  0x20   :  { %98 = dma.hbm_to_vmem [thread:$0]  %s94_s11, 16, %s96_s3, [#allocation11]  }
  0x21   :  { %146 = dma.hbm_to_vmem [thread:$0]  %s142_s28, 16, %s144_s20, [#allocation17]  }
  0x22   :  { %s117_s30 = sshll.u32 %s1809_s8, 4  ;;  %s164_s26 = sshll.u32 %s1780_s15, 4  ;;  %s118_s30 = int_to_ptr.hbm [resolvable:$true] %s117_s30  ;;  %s165_s26 = int_to_ptr.hbm [resolvable:$true] %s164_s26 }
  0x23   :  { %122 = dma.hbm_to_vmem [thread:$0]  %s118_s30, 16, %s120_s14, [#allocation14]  }
  0x24   :  { %s1462_s6 = smov [#allocation19]   ;;  %s196_s12 = sshll.u32 %s1785_s21, 4  ;;  %s197_s12 = int_to_ptr.hbm [resolvable:$true] %s196_s12 }
  0x25   :  { %s166_s11 = sshll.u32 %s1462_s6, 4  ;;  %s1463_s7 = smov 64   ;;  %s167_s11 = int_to_ptr.vmem [resolvable:$true] %s166_s11 }
  0x26   :  { %s1464_s4 = smov 4   ;;  %s1465_s8 = smov [#allocation22]  }
  0x27   :  { %172 = dma.hbm_to_vmem [thread:$0]  %s165_s26, 256, %s167_s11, [#allocation20], %s1463_s7, %s1463_s7, %s1464_s4  }
  0x28   :  { %s198_s30 = sshll.u32 %s1465_s8, 4  ;;  %s1810_s15 = sld [smem:[#allocation36_spill]]  ;;  %s199_s30 = int_to_ptr.vmem [resolvable:$true] %s198_s30 }
  0x29   :  { %204 = dma.hbm_to_vmem [thread:$0]  %s197_s12, 256, %s199_s30, [#allocation23], %s1463_s7, %s1463_s7, %s1464_s4  }
  0x2a   :  { %s1811_s14 = sld [smem:[#allocation38_spill]]  ;;  %s1466_s20 = smov [#allocation5]  }
  0x2b   :  { %s60_s29 = sshll.u32 %s1466_s20, 4  ;;  %s1467_s1 = smov [#allocation9]   ;;  %s61_s29 = int_to_ptr.vmem [resolvable:$true] %s60_s29 }
  0x2c   :  { %s82_s26 = sshll.u32 %s1467_s1, 4  ;;  %s1812_s2 = sld [smem:[#allocation41_spill]]  ;;  %s83_s26 = int_to_ptr.vmem [resolvable:$true] %s82_s26 }
  0x2d   :  { %s1813_s30 = sld [smem:[#allocation43_spill]]  ;;  %s1468_s5 = smov [#allocation12]  }
  0x2e   :  { %s58_s28 = sshll.u32 %s1810_s15, 4  ;;  %s105_s15 = sshll.u32 %s1468_s5, 4  ;;  %s59_s28 = int_to_ptr.hbm [resolvable:$true] %s58_s28  ;;  %s106_s15 = int_to_ptr.vmem [resolvable:$true] %s105_s15 }
  0x2f   :  { %63 = dma.hbm_to_vmem [thread:$0]  %s59_s28, 16, %s61_s29, [#allocation6]  }
  0x30   :  { %s80_s10 = sshll.u32 %s1811_s14, 4  ;;  %s1469_s28 = smov [#allocation15]   ;;  %s81_s10 = int_to_ptr.hbm [resolvable:$true] %s80_s10 }
  0x31   :  { %85 = dma.hbm_to_vmem [thread:$0]  %s81_s10, 16, %s83_s26, [#allocation8]  }
  0x32   :  { %s103_s3 = sshll.u32 %s1812_s2, 4  ;;  %s129_s21 = sshll.u32 %s1469_s28, 4  ;;  %s104_s3 = int_to_ptr.hbm [resolvable:$true] %s103_s3  ;;  %s130_s21 = int_to_ptr.vmem [resolvable:$true] %s129_s21 }
  0x33   :  { %s127_s9 = sshll.u32 %s1813_s30, 4  ;;  %s152_s20 = sshll.u32 %s1778_s13, 4  ;;  %s128_s9 = int_to_ptr.hbm [resolvable:$true] %s127_s9  ;;  %s153_s20 = int_to_ptr.hbm [resolvable:$true] %s152_s20 }
  0x34   :  { %111 = dma.hbm_to_vmem [thread:$0]  %s104_s3, 256, %s106_s15, [#allocation11], %s1463_s7, %s1463_s7, %s1464_s4  }
  0x35   :  { %135 = dma.hbm_to_vmem [thread:$0]  %s128_s9, 256, %s130_s21, [#allocation14], %s1463_s7, %s1463_s7, %s1464_s4  }
  0x36   :  { %s178_s1 = sshll.u32 %s1781_s16, 4  ;;  %s1470_s26 = smov [#allocation18]   ;;  %s179_s1 = int_to_ptr.hbm [resolvable:$true] %s178_s1 }
  0x37   :  { %s154_s6 = sshll.u32 %s1470_s26, 4  ;;  %s1471_s11 = smov [#allocation21]   ;;  %s155_s6 = int_to_ptr.vmem [resolvable:$true] %s154_s6 }
  0x38   :  { %157 = dma.hbm_to_vmem [thread:$0]  %s153_s20, 16, %s155_s6, [#allocation17]  }
  0x39   :  { %s180_s2 = sshll.u32 %s1471_s11, 4  ;;  %s211_s13 = sshll.u32 %s1787_s23, 4  ;;  %s181_s2 = int_to_ptr.vmem [resolvable:$true] %s180_s2  ;;  %s212_s13 = int_to_ptr.hbm [resolvable:$true] %s211_s13 }
  0x3a   :  { %183 = dma.hbm_to_vmem [thread:$0]  %s179_s1, 16, %s181_s2, [#allocation20]  }
  0x3b   :  { %s1472_s12 = smov [#allocation24]  }
  0x3c   :  { %s213_s30 = sshll.u32 %s1472_s12, 4  ;;  %s214_s30 = int_to_ptr.vmem [resolvable:$true] %s213_s30 }
  0x3d   :  { %219 = dma.hbm_to_vmem [thread:$0]  %s212_s13, 256, %s214_s30, [#allocation23], %s1463_s7, %s1463_s7, %s1464_s4  }
  0x3e   :  { %1444 = dma.done.wait [#allocation6], 16  }
  0x3f   :  { %1445 = vsyncadd [#allocation6], 4294967280 }
  0x40   :  { %1446 = dma.done.wait [#allocation8], 32  }
  0x41   :  { %1447 = vsyncadd [#allocation8], 4294967264 }
  0x42   :  { %1448 = dma.done.wait [#allocation11], 272  }
  0x43   :  { %1449 = vsyncadd [#allocation11], 4294967024 }
  0x44   :  { %1450 = dma.done.wait [#allocation14], 272  }
  0x45   :  { %1451 = vsyncadd [#allocation14], 4294967024 }
  0x46   :  { %1452 = dma.done.wait [#allocation17], 32  }
  0x47   :  { %1453 = vsyncadd [#allocation17], 4294967264 }
  0x48   :  { %1454 = dma.done.wait [#allocation20], 272  }
  0x49   :  { %1455 = vsyncadd [#allocation20], 4294967024 }
  0x4a   :  { %1456 = dma.done.wait [#allocation23], 512  }
  0x4b   :  { %1457 = vsyncadd [#allocation23], 4294966784  ;;  %s1814_s9 = sld [smem:[#allocation35_spill]]  ;;  %vm297_vm0 = vcmask 130048   ;;  %v1079_v7 = vld [vmem:[#allocation5] ss:$0 sm:$0xff] }
  0x4c   :  { %s1815_s4 = sld [smem:[#allocation32_spill]]  ;;  %vm333_vm1 = vcmask 261120   ;;  %v1473_v32 = vmov 32.0   ;;  %vm462_vm9 = vcmask 1043456   ;;  %vm458_vm10 = vcmask 64512  }
  0x4d   :  { %s1816_s14 = sld [smem:[#allocation39_spill]] }
  0x4e   :  { %s1817_s26 = sld [smem:[#allocation34_spill]] }
  0x4f   :  { %s1818_s2 = sld [smem:[#allocation33_spill]] }
  0x51   :  { %v1045_v3 = vld [vmem:[%s1814_s9] sm:$0xff] }
  0x52   :  { %v282_v4 = vld [vmem:[%s1815_s4] sm:$0xff]  ;;  %v283_v5 = vld [vmem:[%s1815_s4 + $0x8] sm:$0xff]  ;;  %308 = vmatpush.bf16.msra.mxu0 %v1045_v3 }
  0x53   :  { %v286_v6 = vpack.c.bf16 %v283_v5, %v282_v4  ;;  %v1047_v49 = vld [vmem:[%s1816_s14 + $0x8] sm:$0xff]  ;;  %v1046_v51 = vld [vmem:[%s1816_s14] sm:$0xff] }
  0x54   :  { %427 = vmatpush.bf16.msra.mxu1 %v1047_v49 }
  0x55   :  { %967 = vmatmul.msk.bf16.vlgmr.msra.gmra.mxu0 %vm297_vm0, %v286_v6  ;;  %v1080_v6 = vld [vmem:[#allocation7] ss:$0 sm:$0xff] }
  0x58   :  { %428 = vmatpush.bf16.msra.mxu1 %v1046_v51 }
  0xd2   :  { %v310_v8 = vpop.f32.mrf.mxu0 }
  0xd3   :  { %v311_v9 = vadd.f32 %v1079_v7, %v310_v8 }
  0xd5   :  { %v317_v10 = vmul.f32 0.044715, %v311_v9  ;;  %v315_v23 = vmul.f32 0.5, %v311_v9 }
  0xd7   :  { %v319_v11 = vmul.f32 %v317_v10, %v311_v9 }
  0xd9   :  { %v321_v12 = vmul.f32 %v319_v11, %v311_v9  ;;  %v1081_v11 = vld [vmem:[#allocation9] ss:$0 sm:$0xff] }
  0xda   :  { %v312_v13 = vpop.f32.mrf.mxu0 }
  0xdb   :  { %v313_v14 = vadd.f32 %v1079_v7, %v312_v13  ;;  %v323_v15 = vadd.f32 %v321_v12, %v311_v9 }
  0xdd   :  { %v318_v16 = vmul.f32 0.044715, %v313_v14  ;;  %v325_v17 = vmul.f32 0.7978845, %v323_v15  ;;  %v316_v28 = vmul.f32 0.5, %v313_v14 }
  0xdf   :  { %1094 = vtanh.f32 %v325_v17  ;;  %v320_v18 = vmul.f32 %v318_v16, %v313_v14  ;;  %v1082_v17 = vld [vmem:[#allocation10] ss:$0 sm:$0xff] }
  0xe1   :  { %v322_v19 = vmul.f32 %v320_v18, %v313_v14 }
  0xe3   :  { %v324_v20 = vadd.f32 %v322_v19, %v313_v14 }
  0xe5   :  { %v1095_v21 = vpop.eup %1094  ;;  %v326_v22 = vmul.f32 0.7978845, %v324_v20 }
  0xe6   :  { %v329_v24 = vadd.f32 1.0, %v1095_v21 }
  0xe7   :  { %1096 = vtanh.f32 %v326_v22  ;;  %v1703_v22 = vld [vmem:[%s1817_s26] sm:$0xf] }
  0xe8   :  { %v331_v25 = vmul.f32 %v329_v24, %v315_v23  ;;  %1098 = vrcp.f32 %v1473_v32 }
  0xea   :  { %v334_v26 = vsel %vm333_vm1, %v331_v25, 0.0 }
  0xeb   :  { %335 = vadd.xlane.f32.xlu0 %v334_v26  ;;  %v1044_v26 = vld [vmem:[%s1818_s2] sm:$0xff] }
  0xed   :  { %v1097_v27 = vpop.eup %1096 }
  0xee   :  { %v330_v29 = vadd.f32 1.0, %v1097_v27  ;;  %v1099_v33 = vpop.eup %1098 }
  0xef   :  { %v341_v34 = vmul.f32 32.0, %v1099_v33  ;;  %vm345_vm2 = vweird.f32 %v1099_v33 }
  0xf0   :  { %v332_v30 = vmul.f32 %v330_v29, %v316_v28  ;;  %v1049_v28 = vld [vmem:[#allocation12 + $0x8] sm:$0xff]  ;;  %v1048_v29 = vld [vmem:[#allocation12] sm:$0xff] }
  0xf1   :  { %v342_v35 = vsub.f32 1.0, %v341_v34  ;;  %528 = vmatpush.bf16.msrb.mxu0 %v1049_v28  ;;  %v1084_v28 = vld [vmem:[#allocation16] ss:$0 sm:$0xff] }
  0xf2   :  { %v337_v31 = vsel %vm333_vm1, %v332_v30, 0.0 }
  0xf3   :  { %338 = vadd.xlane.f32.xlu0 %v337_v31  ;;  %v343_v36 = vmul.f32 %v1099_v33, %v342_v35 }
  0xf5   :  { %v344_v37 = vadd.f32 %v1099_v33, %v343_v36  ;;  %529 = vmatpush.bf16.msrb.mxu0 %v1048_v29 }
  0xf7   :  { %v346_v38 = vsel %vm345_vm2, %v1099_v33, %v344_v37 }
 0x15e   :  { %v336_v39 = vpop.xlane.xlu0 %335 }
 0x15f   :  { %v347_v40 = vmul.f32 %v346_v38, %v336_v39 }
 0x161   :  { %v349_v41 = vsub.f32 %v331_v25, %v347_v40 }
 0x163   :  { %v351_v42 = vmul.f32 %v349_v41, %v349_v41 }
 0x165   :  { %v353_v43 = vsel %vm333_vm1, %v351_v42, 0.0 }
 0x166   :  { %354 = vadd.xlane.f32.xlu1 %v353_v43  ;;  %v339_v44 = vpop.xlane.xlu0 %338 }
 0x167   :  { %v348_v45 = vmul.f32 %v346_v38, %v339_v44 }
 0x169   :  { %v350_v46 = vsub.f32 %v332_v30, %v348_v45 }
 0x16b   :  { %v352_v47 = vmul.f32 %v350_v46, %v350_v46 }
 0x16d   :  { %v356_v48 = vsel %vm333_vm1, %v352_v47, 0.0 }
 0x16e   :  { %357 = vadd.xlane.f32.xlu1 %v356_v48 }
 0x1d9   :  { %v355_v50 = vpop.xlane.xlu1 %354 }
 0x1da   :  { %v359_v52 = vmul.f32 %v355_v50, %v346_v38 }
 0x1dc   :  { %v361_v53 = vadd.f32 1e-05, %v359_v52 }
 0x1de   :  { %1100 = vrsqrt.f32 %v361_v53  ;;  %vm369_vm4 = vweird.f32 %v361_v53 }
 0x1e1   :  { %v358_v54 = vpop.xlane.xlu1 %357 }
 0x1e2   :  { %v360_v55 = vmul.f32 %v358_v54, %v346_v38  ;;  %v1083_v54 = vld [vmem:[#allocation13] ss:$0 sm:$0xff] }
 0x1e4   :  { %v1101_v56 = vpop.eup %1100  ;;  %v362_v57 = vadd.f32 1e-05, %v360_v55 }
 0x1e5   :  { %v364_v58 = vmul.f32 %v1101_v56, %v361_v53  ;;  %vm370_vm3 = vweird.f32 %v1101_v56 }
 0x1e6   :  { %1102 = vrsqrt.f32 %v362_v57  ;;  %vm371_vm5 = vmor %vm369_vm4, %vm370_vm3  ;;  %vm379_vm7 = vweird.f32 %v362_v57 }
 0x1e7   :  { %v365_v59 = vmul.f32 %v1101_v56, %v364_v58 }
 0x1e9   :  { %v366_v60 = vmul.f32 0.5, %v365_v59 }
 0x1eb   :  { %v367_v61 = vsub.f32 1.5, %v366_v60 }
 0x1ec   :  { %v1103_v62 = vpop.eup %1102 }
 0x1ed   :  { %v368_v63 = vmul.f32 %v1101_v56, %v367_v61  ;;  %v374_v0 = vmul.f32 %v1103_v62, %v362_v57  ;;  %vm380_vm6 = vweird.f32 %v1103_v62 }
 0x1ee   :  { %vm381_vm8 = vmor %vm379_vm7, %vm380_vm6 }
 0x1ef   :  { %v375_v1 = vmul.f32 %v1103_v62, %v374_v0  ;;  %v372_v2 = vsel %vm371_vm5, %v1101_v56, %v368_v63  ;;  %v1051_v0 = vld [vmem:[#allocation15 + $0x8] sm:$0xff] }
 0x1f0   :  { %v383_v5 = vmul.f32 %v372_v2, %v349_v41  ;;  %616 = vmatpush.bf16.msrb.mxu1 %v1051_v0 }
 0x1f1   :  { %v376_v3 = vmul.f32 0.5, %v375_v1  ;;  %v1050_v1 = vld [vmem:[#allocation15] sm:$0xff] }
 0x1f2   :  { %v389_v10 = vmul.f32 %v1080_v6, %v383_v5 }
 0x1f3   :  { %v377_v4 = vsub.f32 1.5, %v376_v3 }
 0x1f4   :  { %v395_v13 = vadd.f32 %v1081_v11, %v389_v10  ;;  %617 = vmatpush.bf16.msrb.mxu1 %v1050_v1 }
 0x1f5   :  { %v378_v7 = vmul.f32 %v1103_v62, %v377_v4 }
 0x1f7   :  { %v382_v8 = vsel %vm381_vm8, %v1103_v62, %v378_v7  ;;  %vm950_vm8 = vcmask 15360  }
 0x1f8   :  { %v384_v9 = vmul.f32 %v382_v8, %v350_v46 }
 0x1fa   :  { %v390_v12 = vmul.f32 %v1080_v6, %v384_v9 }
 0x1fc   :  { %v396_v14 = vadd.f32 %v1081_v11, %v390_v12 }
 0x1fe   :  { %v401_v15 = vpack.c.bf16 %v396_v14, %v395_v13 }
 0x200   :  { %976 = vmatmul.msk.bf16.vlgmr.msra.gmra.mxu1 %vm333_vm1, %v401_v15 }
 0x27d   :  { %v430_v16 = vpop.f32.mrf.mxu1 }
 0x27e   :  { %v431_v19 = vadd.f32 %v1082_v17, %v430_v16 }
 0x285   :  { %v432_v18 = vpop.f32.mrf.mxu1 }
 0x286   :  { %v433_v20 = vadd.f32 %v1082_v17, %v432_v18 }
 0x288   :  { %v435_v21 = vpack.c.bf16 %v433_v20, %v431_v19 }
 0x28a   :  { %446 = vmatpush.bf16.msra.mxu2 %v435_v21 }
 0x28d   :  { %977 = vmatmul.msk.bf16.vlgmr.msra.gmra.mxu2 %vm297_vm0, %v1703_v22 }
 0x310   :  { %v448_v23 = vpop.f32.mrf.mxu2 }
 0x311   :  { %v452_v24 = vpack.c.bf16 %v448_v23, %v448_v23 }
 0x313   :  { %v464_v25 = vsel %vm462_vm9, %v452_v24, 0 }
 0x314   :  { %473 = vmatpush.bf16.msra.mxu3 %v464_v25 }
 0x317   :  { %982 = vmatmul.msk.bf16.vlgmr.msra.gmra.mxu3 %vm458_vm10, %v1044_v26 }
 0x318   :  { %v450_v27 = vpop.f32.mrf.mxu2 }
 0x39a   :  { %v475_v30 = vpop.f32.mrf.mxu3 }
 0x39b   :  { %v476_v31 = vadd.f32 %v475_v30, %v395_v13 }
 0x39d   :  { %v482_v32 = vmul.f32 0.044715, %v476_v31  ;;  %v480_v47 = vmul.f32 0.5, %v476_v31 }
 0x39f   :  { %v484_v33 = vmul.f32 %v482_v32, %v476_v31 }
 0x3a1   :  { %v486_v34 = vmul.f32 %v484_v33, %v476_v31  ;;  %v1052_v33 = vld [vmem:[#allocation19] sm:$0xff] }
 0x3a2   :  { %v477_v35 = vpop.f32.mrf.mxu3 }
 0x3a3   :  { %v488_v36 = vadd.f32 %v486_v34, %v476_v31  ;;  %v478_v37 = vadd.f32 %v477_v35, %v396_v14  ;;  %v1085_v34 = vld [vmem:[#allocation18] ss:$0 sm:$0xff] }
 0x3a5   :  { %v483_v38 = vmul.f32 0.044715, %v478_v37  ;;  %v490_v39 = vmul.f32 0.7978845, %v488_v36  ;;  %v481_v48 = vmul.f32 0.5, %v478_v37 }
 0x3a7   :  { %v485_v40 = vmul.f32 %v483_v38, %v478_v37  ;;  %1104 = vtanh.f32 %v490_v39 }
 0x3a9   :  { %v487_v41 = vmul.f32 %v485_v40, %v478_v37 }
 0x3ab   :  { %v489_v42 = vadd.f32 %v487_v41, %v478_v37  ;;  %v1055_v41 = vld [vmem:[%s1782_s17 + $0x8] sm:$0xff] }
 0x3ad   :  { %v491_v43 = vmul.f32 0.7978845, %v489_v42  ;;  %v1105_v44 = vpop.eup %1104  ;;  %v1087_v42 = vld [vmem:[#allocation21] ss:$0 sm:$0xff] }
 0x3ae   :  { %v494_v45 = vadd.f32 1.0, %v1105_v44 }
 0x3af   :  { %1106 = vtanh.f32 %v491_v43 }
 0x3b0   :  { %v496_v50 = vmul.f32 %v494_v45, %v480_v47 }
 0x3b5   :  { %v1107_v46 = vpop.eup %1106 }
 0x3b6   :  { %v495_v49 = vadd.f32 1.0, %v1107_v46 }
 0x3b8   :  { %v497_v51 = vmul.f32 %v495_v49, %v481_v48 }
 0x3ba   :  { %v502_v52 = vpack.c.bf16 %v497_v51, %v496_v50 }
 0x3bc   :  { %991 = vmatmul.msk.bf16.vlgmr.msrb.gmra.mxu0 %vm333_vm1, %v502_v52 }
 0x439   :  { %v531_v53 = vpop.f32.mrf.mxu0 }
 0x43a   :  { %v532_v56 = vadd.f32 %v1083_v54, %v531_v53 }
 0x441   :  { %v533_v55 = vpop.f32.mrf.mxu0 }
 0x442   :  { %v534_v57 = vadd.f32 %v1083_v54, %v533_v55 }
 0x444   :  { %v536_v58 = vpack.c.bf16 %v534_v57, %v532_v56  ;;  %v1088_v56 = vld [vmem:[%s1783_s18] ss:$0 sm:$0xff]  ;;  %s1475_s18 = smov 1  }
 0x446   :  { %544 = vmatpush.bf16.msrb.mxu2 %v536_v58 }
 0x449   :  { %992 = vmatmul.msk.bf16.vlgmr.msrb.gmra.mxu2 %vm297_vm0, %v1703_v22 }
 0x4cc   :  { %v546_v59 = vpop.f32.mrf.mxu2 }
 0x4cd   :  { %v547_v60 = vadd.f32 %v546_v59, %v448_v23 }
 0x4cf   :  { %v550_v61 = vpack.c.bf16 %v547_v60, %v547_v60 }
 0x4d1   :  { %v552_v62 = vsel %vm462_vm9, %v550_v61, 0 }
 0x4d2   :  { %561 = vmatpush.bf16.msrb.mxu3 %v552_v62 }
 0x4d4   :  { %v548_v63 = vpop.f32.mrf.mxu2 }
 0x4d5   :  { %993 = vmatmul.msk.bf16.vlgmr.msrb.gmra.mxu3 %vm458_vm10, %v1044_v26  ;;  %v1053_v26 = vld [vmem:[#allocation19 + $0x8] sm:$0xff] }
 0x4d6   :  { %700 = vmatpush.bf16.msra.mxu2 %v1053_v26  ;;  %746 = vmatpush.bf16.msra.mxu3 %v1055_v41 }
 0x4da   :  { %701 = vmatpush.bf16.msra.mxu2 %v1052_v33 }
 0x558   :  { %v563_v2 = vpop.f32.mrf.mxu3 }
 0x559   :  { %v564_v3 = vadd.f32 %v563_v2, %v496_v50 }
 0x55b   :  { %v570_v4 = vmul.f32 0.044715, %v564_v3  ;;  %v568_v19 = vmul.f32 0.5, %v564_v3 }
 0x55d   :  { %v572_v5 = vmul.f32 %v570_v4, %v564_v3  ;;  %v1089_v4 = vld [vmem:[%s1784_s19] ss:$0 sm:$0xff] }
 0x55f   :  { %v574_v6 = vmul.f32 %v572_v5, %v564_v3 }
 0x560   :  { %v565_v7 = vpop.f32.mrf.mxu3 }
 0x561   :  { %v576_v8 = vadd.f32 %v574_v6, %v564_v3  ;;  %v566_v9 = vadd.f32 %v565_v7, %v497_v51 }
 0x563   :  { %v571_v10 = vmul.f32 0.044715, %v566_v9  ;;  %v578_v11 = vmul.f32 0.7978845, %v576_v8  ;;  %v569_v20 = vmul.f32 0.5, %v566_v9 }
 0x564   :  { %v1086_v8 = vld [vmem:[#allocation2] ss:$0 sm:$0xff] }
 0x565   :  { %v573_v12 = vmul.f32 %v571_v10, %v566_v9  ;;  %1108 = vtanh.f32 %v578_v11 }
 0x567   :  { %v575_v13 = vmul.f32 %v573_v12, %v566_v9  ;;  %v1474_v12 = vmov 0  }
 0x568   :  { %1078 = vset.pattern.permute.xlu0 %v1474_v12 }
 0x569   :  { %v577_v14 = vadd.f32 %v575_v13, %v566_v9 }
 0x56b   :  { %v579_v15 = vmul.f32 0.7978845, %v577_v14  ;;  %v1109_v16 = vpop.eup %1108  ;;  %v1090_v14 = vld [vmem:[#allocation3] ss:$0 sm:$0xff] }
 0x56c   :  { %v582_v17 = vadd.f32 1.0, %v1109_v16 }
 0x56d   :  { %1110 = vtanh.f32 %v579_v15 }
 0x56e   :  { %v584_v23 = vmul.f32 %v582_v17, %v568_v19  ;;  %v1057_v19 = vld [vmem:[#allocation22 + $0x8] sm:$0xff] }
 0x56f   :  { %832 = vmatpush.bf16.msra.mxu1 %v1057_v19 }
 0x573   :  { %v1111_v18 = vpop.eup %1110 }
 0x574   :  { %v583_v21 = vadd.f32 1.0, %v1111_v18 }
 0x576   :  { %v585_v24 = vmul.f32 %v583_v21, %v569_v20 }
 0x578   :  { %v590_v25 = vpack.c.bf16 %v585_v24, %v584_v23 }
 0x57a   :  { %1002 = vmatmul.msk.bf16.vlgmr.msrb.gmra.mxu1 %vm333_vm1, %v590_v25 }
 0x5f7   :  { %v619_v27 = vpop.f32.mrf.mxu1 }
 0x5f8   :  { %v620_v30 = vadd.f32 %v1084_v28, %v619_v27 }
 0x5ff   :  { %v621_v29 = vpop.f32.mrf.mxu1 }
 0x600   :  { %v622_v31 = vadd.f32 %v1084_v28, %v621_v29 }
 0x602   :  { %v624_v32 = vpack.c.bf16 %v622_v31, %v620_v30 }
 0x604   :  { %632 = vmatpush.bf16.msra.mxu0 %v624_v32 }
 0x607   :  { %1003 = vmatmul.msk.bf16.vlgmr.msra.gmra.mxu0 %vm297_vm0, %v1703_v22  ;;  %v1054_v22 = vld [vmem:[%s1782_s17] sm:$0xff] }
 0x608   :  { %747 = vmatpush.bf16.msra.mxu3 %v1054_v22 }
 0x684   :  { %v634_v35 = vpop.f32.mrf.mxu0 }
 0x685   :  { %v635_v36 = vadd.f32 %v634_v35, %v547_v60 }
 0x687   :  { %v674_v37 = vpack.c.bf16 %v635_v36, %v635_v36  ;;  %v642_v38 = vmul.f32 %v1085_v34, %v635_v36 }
 0x689   :  { %1013 = vmatmul.msk.bf16.vlgmr.msra.gmra.mxu2 %vm333_vm1, %v674_v37  ;;  %v643_v39 = vsel %vm333_vm1, %v642_v38, 0.0 }
 0x68a   :  { %644 = vadd.xlane.f32.xlu2 %v643_v39 }
 0x68c   :  { %v636_v40 = vpop.f32.mrf.mxu0 }
 0x6fd   :  { %v645_v9 = vpop.xlane.xlu2 %644 }
 0x6fe   :  { %v650_v10 = vadd.f32 %v1086_v8, %v645_v9 }
 0x700   :  { %v1004_v11 = vmul.f32 -1.442695, %v650_v10 }
 0x70c   :  { %v703_v43 = vpop.f32.mrf.mxu2 }
 0x70d   :  { %v704_v44 = vadd.f32 %v1087_v42, %v703_v43 }
 0x70f   :  { %v708_v45 = vmul.f32 0.044715, %v704_v44  ;;  %v707_v52 = vmul.f32 0.5, %v704_v44 }
 0x711   :  { %v709_v46 = vmul.f32 %v708_v45, %v704_v44 }
 0x713   :  { %v710_v47 = vmul.f32 %v709_v46, %v704_v44 }
 0x714   :  { %v705_v48 = vpop.f32.mrf.mxu2 }
 0x715   :  { %v711_v49 = vadd.f32 %v710_v47, %v704_v44  ;;  %v1056_v44 = vld [vmem:[#allocation22] sm:$0xff]  ;;  %v1059_v48 = vld [vmem:[#allocation24 + $0x8] sm:$0xff] }
 0x716   :  { %833 = vmatpush.bf16.msra.mxu1 %v1056_v44  ;;  %878 = vmatpush.bf16.msrb.mxu0 %v1059_v48 }
 0x717   :  { %v712_v50 = vmul.f32 0.7978845, %v711_v49  ;;  %v1058_v49 = vld [vmem:[#allocation24] sm:$0xff] }
 0x719   :  { %1112 = vtanh.f32 %v712_v50  ;;  %v1091_v50 = vld [vmem:[%s1786_s22] ss:$0 sm:$0xff] }
 0x71a   :  { %879 = vmatpush.bf16.msrb.mxu0 %v1058_v49 }
 0x71f   :  { %v1113_v51 = vpop.eup %1112 }
 0x720   :  { %v714_v53 = vadd.f32 1.0, %v1113_v51 }
 0x722   :  { %v1728_v54 = vmul.f32 %v714_v53, %v707_v52 }
 0x724   :  { %v720_v55 = vpack.c.bf16 %v1728_v54, %v1728_v54 }
 0x726   :  { %1022 = vmatmul.msk.bf16.vlgmr.msra.gmra.mxu3 %vm333_vm1, %v720_v55 }
 0x7a9   :  { %v749_v57 = vpop.f32.mrf.mxu3 }
 0x7aa   :  { %v750_v58 = vadd.f32 %v1088_v56, %v749_v57 }
 0x7ac   :  { %v754_v59 = vmul.f32 0.044715, %v750_v58  ;;  %v753_v2 = vmul.f32 0.5, %v750_v58 }
 0x7ae   :  { %v755_v60 = vmul.f32 %v754_v59, %v750_v58 }
 0x7b0   :  { %v756_v61 = vmul.f32 %v755_v60, %v750_v58 }
 0x7b1   :  { %v751_v62 = vpop.f32.mrf.mxu3 }
 0x7b2   :  { %v757_v63 = vadd.f32 %v756_v61, %v750_v58 }
 0x7b4   :  { %v758_v0 = vmul.f32 0.7978845, %v757_v63 }
 0x7b6   :  { %1114 = vtanh.f32 %v758_v0  ;;  %v898_v0 = vld [vmem:[%s1789_s25 + $0x18] sm:$0xff] }
 0x7b7   :  { %1116 = vpow2.f32 %v1004_v11  ;;  %918 = vmatpush.msrb.mxu2 %v898_v0 }
 0x7bc   :  { %v1115_v1 = vpop.eup %1114 }
 0x7bd   :  { %v760_v3 = vadd.f32 1.0, %v1115_v1  ;;  %v1117_v13 = vpop.eup %1116  ;;  %v897_v1 = vld [vmem:[%s1789_s25 + $0x10] sm:$0xff] }
 0x7be   :  { %v654_v15 = vadd.f32 1.0, %v1117_v13  ;;  %919 = vmatpush.msrb.mxu2 %v897_v1 }
 0x7bf   :  { %v761_v5 = vmul.f32 %v760_v3, %v753_v2  ;;  %v896_v2 = vld [vmem:[%s1789_s25 + $0x8] sm:$0xff]  ;;  %v895_v3 = vld [vmem:[%s1789_s25] sm:$0xff] }
 0x7c0   :  { %1118 = vrcp.f32 %v654_v15  ;;  %vm660_vm12 = vweird.f32 %v654_v15  ;;  %v666_v31 = vand.u32 2147483648, %v654_v15  ;;  %v664_v33 = vand.u32 2147483647, %v654_v15  ;;  %920 = vmatpush.msrb.mxu2 %v896_v2 }
 0x7c1   :  { %v766_v6 = vmul.f32 %v1089_v4, %v761_v5  ;;  %v1092_v4 = vld [vmem:[%s1788_s24] ss:$0 sm:$0xff] }
 0x7c2   :  { %v667_v38 = vor.u32 1.1754944e-38, %v666_v31  ;;  %vm665_vm2 = vcmp.eq.f32.partialorder %v664_v33, 8.507059e+37  ;;  %921 = vmatpush.msrb.mxu2 %v895_v3 }
 0x7c3   :  { %v767_v7 = vsel %vm333_vm1, %v766_v6, 0.0 }
 0x7c4   :  { %768 = vadd.xlane.f32.xlu2 %v767_v7 }
 0x7c6   :  { %v1119_v20 = vpop.eup %1118 }
 0x7c7   :  { %v656_v23 = vmul.f32 %v1119_v20, %v654_v15  ;;  %vm661_vm11 = vweird.f32 %v1119_v20 }
 0x7c8   :  { %vm662_vm14 = vmor %vm660_vm12, %vm661_vm11 }
 0x7c9   :  { %v657_v25 = vsub.f32 1.0, %v656_v23 }
 0x7cb   :  { %v658_v26 = vmul.f32 %v1119_v20, %v657_v25 }
 0x7cd   :  { %v659_v29 = vadd.f32 %v1119_v20, %v658_v26 }
 0x7cf   :  { %v663_v36 = vsel %vm662_vm14, %v1119_v20, %v659_v29 }
 0x7d0   :  { %v668_v41 = vsel %vm665_vm2, %v667_v38, %v663_v36 }
 0x837   :  { %v769_v16 = vpop.xlane.xlu2 %768 }
 0x838   :  { %v774_v17 = vadd.f32 %v1090_v14, %v769_v16 }
 0x83a   :  { %v1023_v18 = vmul.f32 -1.442695, %v774_v17 }
 0x83c   :  { %1120 = vpow2.f32 %v1023_v18  ;;  %v1093_v18 = vld [vmem:[#allocation4] ss:$0 sm:$0xff] }
 0x842   :  { %v1121_v21 = vpop.eup %1120 }
 0x843   :  { %v778_v24 = vadd.f32 1.0, %v1121_v21 }
 0x845   :  { %1122 = vrcp.f32 %v778_v24  ;;  %v790_v32 = vand.u32 2147483648, %v778_v24  ;;  %v788_v35 = vand.u32 2147483647, %v778_v24  ;;  %vm784_vm15 = vweird.f32 %v778_v24 }
 0x847   :  { %v791_v39 = vor.u32 1.1754944e-38, %v790_v32  ;;  %vm789_vm3 = vcmp.eq.f32.partialorder %v788_v35, 8.507059e+37 }
 0x84b   :  { %v1123_v27 = vpop.eup %1122 }
 0x84c   :  { %v780_v28 = vmul.f32 %v1123_v27, %v778_v24  ;;  %vm785_vm13 = vweird.f32 %v1123_v27 }
 0x84d   :  { %vm786_vm0 = vmor %vm784_vm15, %vm785_vm13 }
 0x84e   :  { %v781_v30 = vsub.f32 1.0, %v780_v28 }
 0x850   :  { %v782_v34 = vmul.f32 %v1123_v27, %v781_v30 }
 0x852   :  { %v783_v37 = vadd.f32 %v1123_v27, %v782_v34 }
 0x854   :  { %v787_v40 = vsel %vm786_vm0, %v1123_v27, %v783_v37 }
 0x855   :  { %v792_v22 = vsel %vm789_vm3, %v791_v39, %v787_v40 }
 0x856   :  { %v794_v42 = vadd.f32 %v792_v22, %v668_v41 }
 0x858   :  { %v795_v43 = vmul.f32 0.5, %v794_v42 }
 0x85a   :  { %945 = vrot.lane.b32.xlu1 %v795_v43, %s1475_s18  ;;  %798 = vperm.xlu0 %1078, %v795_v43  }
 0x8cc   :  { %v799_v45 = vpop.permute.xlu0 %798  ;;  %v946_v34 = vpop.permute.xlu1 %945 }
 0x8cd   :  { %v801_v46 = vmul.f32 %v799_v45, %v1728_v54 }
 0x8cf   :  { %v806_v47 = vpack.c.bf16 %v801_v46, %v801_v46 }
 0x8d1   :  { %1032 = vmatmul.msk.bf16.vlgmr.msra.gmra.mxu1 %vm333_vm1, %v806_v47 }
 0x94e   :  { %v835_v51 = vpop.f32.mrf.mxu1 }
 0x94f   :  { %v836_v52 = vadd.f32 %v1091_v50, %v835_v51 }
 0x951   :  { %v840_v53 = vmul.f32 0.044715, %v836_v52  ;;  %v839_v60 = vmul.f32 0.5, %v836_v52 }
 0x953   :  { %v841_v55 = vmul.f32 %v840_v53, %v836_v52 }
 0x955   :  { %v842_v56 = vmul.f32 %v841_v55, %v836_v52 }
 0x956   :  { %v837_v57 = vpop.f32.mrf.mxu1 }
 0x957   :  { %v843_v58 = vadd.f32 %v842_v56, %v836_v52 }
 0x959   :  { %v844_v59 = vmul.f32 0.7978845, %v843_v58 }
 0x95b   :  { %1124 = vtanh.f32 %v844_v59 }
 0x961   :  { %v1125_v54 = vpop.eup %1124 }
 0x962   :  { %v846_v61 = vadd.f32 1.0, %v1125_v54 }
 0x964   :  { %v847_v62 = vmul.f32 %v846_v61, %v839_v60 }
 0x966   :  { %v852_v63 = vpack.c.bf16 %v847_v62, %v847_v62 }
 0x968   :  { %1041 = vmatmul.msk.bf16.vlgmr.msrb.gmra.mxu0 %vm333_vm1, %v852_v63 }
 0x9e5   :  { %v881_v5 = vpop.f32.mrf.mxu0 }
 0x9e6   :  { %v882_v6 = vadd.f32 %v1092_v4, %v881_v5 }
 0x9e8   :  { %v886_v7 = vmul.f32 0.044715, %v882_v6  ;;  %v885_v14 = vmul.f32 0.5, %v882_v6 }
 0x9ea   :  { %v887_v8 = vmul.f32 %v886_v7, %v882_v6 }
 0x9ec   :  { %v888_v9 = vmul.f32 %v887_v8, %v882_v6 }
 0x9ed   :  { %v883_v10 = vpop.f32.mrf.mxu0 }
 0x9ee   :  { %v889_v11 = vadd.f32 %v888_v9, %v882_v6 }
 0x9f0   :  { %v890_v12 = vmul.f32 0.7978845, %v889_v11 }
 0x9f2   :  { %1126 = vtanh.f32 %v890_v12 }
 0x9f8   :  { %v1127_v13 = vpop.eup %1126 }
 0x9f9   :  { %v892_v15 = vadd.f32 1.0, %v1127_v13 }
 0x9fb   :  { %v893_v16 = vmul.f32 %v892_v15, %v885_v14 }
 0x9fd   :  { %v894_v17 = vadd.f32 %v893_v16, %v801_v46 }
 0x9ff   :  { %1042 = vmatmul.msk.f32.vlgmr.msrb.gmra.mxu2 %vm333_vm1, %v894_v17  ;;  %vm948_vm1 = vcmask 7168  }
 0xa82   :  { %v923_v19 = vpop.f32.mrf.mxu2 }
 0xa83   :  { %v924_v20 = vadd.f32 %v1093_v18, %v923_v19 }
 0xa85   :  { %v1043_v21 = vmul.f32 -1.442695, %v924_v20 }
 0xa87   :  { %1128 = vpow2.f32 %v1043_v21 }
 0xa8d   :  { %v1129_v23 = vpop.eup %1128 }
 0xa8e   :  { %v929_v24 = vadd.f32 1.0, %v1129_v23 }
 0xa90   :  { %1130 = vrcp.f32 %v929_v24  ;;  %v941_v28 = vand.u32 2147483648, %v929_v24  ;;  %v939_v30 = vand.u32 2147483647, %v929_v24  ;;  %vm935_vm5 = vweird.f32 %v929_v24 }
 0xa92   :  { %v942_v32 = vor.u32 1.1754944e-38, %v941_v28  ;;  %vm940_vm7 = vcmp.eq.f32.partialorder %v939_v30, 8.507059e+37 }
 0xa96   :  { %v1131_v25 = vpop.eup %1130 }
 0xa97   :  { %v931_v26 = vmul.f32 %v1131_v25, %v929_v24  ;;  %vm936_vm4 = vweird.f32 %v1131_v25 }
 0xa98   :  { %vm937_vm6 = vmor %vm935_vm5, %vm936_vm4 }
 0xa99   :  { %v932_v27 = vsub.f32 1.0, %v931_v26 }
 0xa9b   :  { %v933_v29 = vmul.f32 %v1131_v25, %v932_v27 }
 0xa9d   :  { %v934_v31 = vadd.f32 %v1131_v25, %v933_v29 }
 0xa9f   :  { %v938_v33 = vsel %vm937_vm6, %v1131_v25, %v934_v31 }
 0xaa0   :  { %v943_v35 = vsel %vm940_vm7, %v942_v32, %v938_v33 }
 0xaa1   :  { %v949_v36 = vsel %vm948_vm1, %v943_v35, %v946_v34 }
 0xaa2   :  { %951 = vst.msk [vmem:[%s1790_s27] sm:$0xff] %vm950_vm8, %v949_v36 }
 0xaa3   :  { %956 = vsyncpa [#allocation6], 1 }
 0xaa4   :  { %957 = vsyncpa [#allocation8], 1 }
 0xaa5   :  { %958 = vsyncpa [#allocation11], 1 }
 0xaa6   :  { %959 = vsyncpa [#allocation14], 1 }
 0xaa7   :  { %960 = vsyncpa [#allocation17], 1 }
 0xaa8   :  { %961 = vsyncpa [#allocation20], 1 }
 0xaa9   :  { %962 = vsyncpa [#allocation23], 1 }

</bundles_post_ra>
